<compile_context>
chip_gen: v7x
topology: tpu7x:2x2x1
jax: 0.10.0
libtpu: 0.0.40
codegen_flags: <defaults>
</compile_context>

<pallas_src>
import functools

import jax
import jax.numpy as jnp
from jax.experimental import pallas as pl
from jax.experimental.pallas import tpu as pltpu

KERNEL_SIZE = 7
PAD = 3


def _gelu_erf(x):
    # Exact (erf-based) GELU; erf via the Abramowitz & Stegun 7.1.26 polynomial
    # (|abs err| < 1.5e-7), built from Mosaic-supported ops (exp, mul, add, div).
    z = x * jnp.float32(0.7071067811865476)
    a = jnp.abs(z)
    t = 1.0 / (1.0 + 0.3275911 * a)
    poly = t * (0.254829592
                + t * (-0.284496736
                       + t * (1.421413741
                              + t * (-1.453152027
                                     + t * 1.061405429))))
    erf_abs = 1.0 - poly * jnp.exp(-a * a)
    erf = jnp.where(z >= 0, erf_abs, -erf_abs)
    return 0.5 * x * (1.0 + erf)


def _sepconv_kernel(x_ref, w1_ref, wdw_ref, w2_ref, o_ref, pad_ref, acc_ref, *, Hr, lpad):
    """One (batch, med-tile) grid step.  Channel-major, gap-padded flat spatial layout.

    x_ref:   (C, Sr)        input, rows laid out with stride Hr = H + 3 (3 zero gap cols)
    w1_ref:  (mt, C)        pwconv1.weight rows of this med tile
    wdw_ref: (mt, 49)       dwconv weights, tap k = a*7 + b  (a: W-axis, b: H-axis)
    w2_ref:  (C, mt)        pwconv2.weight columns of this med tile
    o_ref:   (C, Sr)        output block (resident across the med-tile axis)
    pad_ref: (mt, L)        zero-haloed depthwise buffer, L = lpad + Sr + rpad
    acc_ref: (C, Sr) f32    pwconv2 accumulator across med tiles
    """
    C, Sr = x_ref.shape
    med_tile, L = pad_ref.shape
    m = pl.program_id(1)

    @pl.when(m == 0)
    def _init():
        acc_ref[...] = jnp.zeros_like(acc_ref)
        # Halos stay zero afterwards (the interior store below fully covers
        # [lpad, lpad+Sr) every step), so this runs once per batch element,
        # not once per grid step.  Both stores are 128-aligned / lane-dense.
        pad_ref[:, :lpad] = jnp.zeros((med_tile, lpad), pad_ref.dtype)
        pad_ref[:, lpad + Sr:] = jnp.zeros((med_tile, L - lpad - Sr), pad_ref.dtype)

    # ---- pwconv1 + exact GELU for this med tile (MXU, f32 accumulation) ----
    t = jnp.dot(w1_ref[...], x_ref[...], preferred_element_type=jnp.float32)
    t = _gelu_erf(t)                       # (mt, Sr) f32; gap/tail columns stay exactly 0

    # ---- depthwise 7x7 ----
    # Lane-aligned unmasked interior store (lpad % 128 == 0, Sr % 128 == 0), then 49
    # static tap slices.  Out-of-range H taps land in the inter-row zero gaps and
    # out-of-range W taps land in the zero halos, so no boundary masks are needed.
    pad_ref[:, lpad:lpad + Sr] = t.astype(pad_ref.dtype)
    tp = pad_ref[...]
    wv = wdw_ref[...]

    dw = jnp.zeros((med_tile, Sr), jnp.float32)
    # TODO(synk): for production spatial sizes add a W-tile grid axis (3-row halo) and/or a
    # 128-aligned row stride so the 49 tap slices collapse to 7 lane realignments; with med
    # tiled, each slice here is only (med_tile, Sr) so the realign work is bounded per step.
    for a in range(KERNEL_SIZE):               # W-axis tap (stride Hr in the flat layout)
        di = a - PAD
        for b in range(KERNEL_SIZE):           # H-axis tap (stride 1)
            dj = b - PAD
            start = lpad + di * Hr + dj        # static offset
            k = a * KERNEL_SIZE + b
            dw = dw + tp[:, start:start + Sr] * wv[:, k:k + 1]

    # ---- pwconv2 partial product for this med tile; accumulate across tiles (f32) ----
    acc_ref[...] += jnp.dot(w2_ref[...], dw.astype(w2_ref.dtype),
                            preferred_element_type=jnp.float32)

    @pl.when(m == pl.num_programs(1) - 1)
    def _finalize():
        o_ref[...] = acc_ref[...].astype(o_ref.dtype)


def _choose_med_tile(med, bytes_per_row, budget_bytes=1 << 20):
    """Largest divisor of `med` (preferring multiples of 8) whose per-step depthwise
    working set stays within `budget_bytes` (keeps the tap loop VMEM/vreg friendly)."""
    divisors = [d for d in range(1, med + 1) if med % d == 0]
    pref = [d for d in divisors if d % 8 == 0] or divisors
    tile = pref[0]
    for d in pref:
        if d * bytes_per_row <= budget_bytes:
            tile = d
    return tile


def sepconv_forward(x_nchw, w1_pt, wdw_pt, w2_pt, *, med_tile=None):
    """SepConv forward.

    x_nchw: (B, C, H, W)
    w1_pt:  (med, C)        = pwconv1.weight   (bias=False)
    wdw_pt: (med, 1, 7, 7)  = dwconv.weight
    w2_pt:  (C, med)        = pwconv2.weight
    Returns (B, C, W, H), exactly like the PyTorch module.
    """
    B, C, H, W = x_nchw.shape
    med = w1_pt.shape[0]
    op_dtype = x_nchw.dtype                      # bf16 in -> bf16 MXU operands & scratch
    itemsize = jnp.dtype(op_dtype).itemsize

    # Flat spatial layout s = w*Hr + h with Hr = H + 3 zero gap columns per row.
    Hr = H + PAD
    Sin = W * Hr
    Sr = pl.cdiv(Sin, 128) * 128                 # lane-dense (multiple of 128)
    reach = PAD * Hr + PAD                       # max |flat tap offset| of the 7x7 window
    lpad = pl.cdiv(reach, 128) * 128             # 128-aligned -> aligned interior store
    rpad = pl.cdiv(reach, 128) * 128
    L = lpad + Sr + rpad

    if med_tile is None:
        med_tile = _choose_med_tile(med, itemsize * L + 4 * Sr)
    assert med % med_tile == 0, "med_tile must divide med_channels"
    n_m = med // med_tile

    # Single wrapper layout pass: (B,C,H,W) -> (B,C,W,H) -> gap-padded rows -> (B,C,Sr).
    x_wh = jnp.transpose(x_nchw, (0, 1, 3, 2))
    x_row = jnp.pad(x_wh, ((0, 0), (0, 0), (0, 0), (0, Hr - H)))
    x_lay = jnp.pad(x_row.reshape(B, C, Sin),
                    ((0, 0), (0, 0), (0, Sr - Sin))).astype(op_dtype)

    # Pre-tile the weights along med: every block equals the full trailing dims of its
    # array (valid for any med_tile under the (8,128) rule) and pwconv2 stays a plain dot.
    w1_t = w1_pt.astype(op_dtype).reshape(n_m, med_tile, C)
    wdw_t = wdw_pt.astype(op_dtype).reshape(n_m, med_tile, KERNEL_SIZE * KERNEL_SIZE)
    w2_t = jnp.transpose(w2_pt.astype(op_dtype).reshape(C, n_m, med_tile), (1, 0, 2))

    kernel = functools.partial(_sepconv_kernel, Hr=Hr, lpad=lpad)

    # VMEM budget (double-buffered blocks + scratch), kept within v7x's 64 MiB physical.
    block_bytes = 2 * itemsize * (C * Sr + med_tile * (2 * C + KERNEL_SIZE * KERNEL_SIZE))
    block_bytes += 2 * itemsize * C * Sr                      # output block
    scratch_bytes = itemsize * med_tile * L + 4 * C * Sr
    vmem_limit = int(min(64 * 2**20, max(32 * 2**20, 2 * (block_bytes + scratch_bytes))))

    flops = 2 * B * Sr * med * (2 * C + KERNEL_SIZE * KERNEL_SIZE)
    bytes_accessed = (itemsize * B * C * Sr                                    # x
                      + itemsize * B * C * Sr                                  # out
                      + itemsize * B * med * (2 * C + KERNEL_SIZE * KERNEL_SIZE))  # weights/batch

    out_lay = pl.pallas_call(
        kernel,
        out_shape=jax.ShapeDtypeStruct((B, C, Sr), x_nchw.dtype),
        grid_spec=pltpu.PrefetchScalarGridSpec(
            num_scalar_prefetch=0,
            grid=(B, n_m),                        # med-tile (reduction) axis innermost
            in_specs=[
                pl.BlockSpec((None, C, Sr), lambda b, m: (b, 0, 0)),          # resident over m
                pl.BlockSpec((None, med_tile, C), lambda b, m: (m, 0, 0)),
                pl.BlockSpec((None, med_tile, KERNEL_SIZE * KERNEL_SIZE),
                             lambda b, m: (m, 0, 0)),
                pl.BlockSpec((None, C, med_tile), lambda b, m: (m, 0, 0)),
            ],
            out_specs=pl.BlockSpec((None, C, Sr), lambda b, m: (b, 0, 0)),    # accumulator
            scratch_shapes=[
                pltpu.VMEM((med_tile, L), op_dtype),     # zero-haloed depthwise buffer
                pltpu.VMEM((C, Sr), jnp.float32),        # pwconv2 accumulator over med tiles
            ],
        ),
        compiler_params=pltpu.CompilerParams(
            dimension_semantics=("parallel", "arbitrary"),
            vmem_limit_bytes=vmem_limit,
        ),
        cost_estimate=pl.CostEstimate(
            flops=int(flops),
            transcendentals=int(B * med * Sr),
            bytes_accessed=int(bytes_accessed),
        ),
    )(x_lay, w1_t, wdw_t, w2_t)

    # Strip the inter-row gaps / lane padding; output is already in the module's
    # (B, C, W, H) order, so no further transpose is needed.
    out = out_lay[:, :, :Sin].reshape(B, C, W, Hr)[:, :, :, :H]
    return out


def ref_forward(x_nchw, w1_pt, wdw_pt, w2_pt):
    """Pure-JAX reference reproducing the PyTorch graph (same GELU polynomial)."""
    med = w1_pt.shape[0]
    with jax.default_matmul_precision("highest"):
        x = jnp.transpose(x_nchw, (0, 3, 2, 1))               # (B, W, H, C)
        x = x @ w1_pt.T
        x = _gelu_erf(x)
        x = jnp.transpose(x, (0, 3, 1, 2))                    # (B, med, W, H)
        x = jax.lax.conv_general_dilated(
            x, wdw_pt, window_strides=(1, 1),
            padding=((PAD, PAD), (PAD, PAD)),
            feature_group_count=med,
            dimension_numbers=('NCHW', 'OIHW', 'NCHW'))
        x = jnp.transpose(x, (0, 2, 3, 1))                    # (B, W, H, med)
        x = x @ w2_pt.T
    return jnp.transpose(x, (0, 3, 1, 2))                     # (B, C, W, H)


if __name__ == "__main__":
    B, dim, H, W = 2, 8, 16, 16
    expansion_ratio = 2
    med = int(expansion_ratio * dim)          # 16 -> two med tiles of 8 exercise the reduction

    key = jax.random.PRNGKey(0)
    k1, k2, k3, kx = jax.random.split(key, 4)

    # PyTorch parameter shapes (bias=False):
    #   pwconv1.weight: (med, dim); dwconv.weight: (med, 1, 7, 7); pwconv2.weight: (dim, med)
    w1_pt = jax.random.normal(k1, (med, dim), jnp.float32) * 0.2
    wdw_pt = jax.random.normal(k2, (med, 1, KERNEL_SIZE, KERNEL_SIZE), jnp.float32) * 0.1
    w2_pt = jax.random.normal(k3, (dim, med), jnp.float32) * 0.2
    x = jax.random.normal(kx, (B, dim, H, W), jnp.float32)

    sepconv = jax.jit(functools.partial(sepconv_forward, med_tile=8))
    y = sepconv(x, w1_pt, wdw_pt, w2_pt)
    jax.block_until_ready(y)

    y_ref = ref_forward(x, w1_pt, wdw_pt, w2_pt)
    assert y.shape == (B, dim, W, H)
    assert jnp.allclose(y, y_ref, atol=1e-4, rtol=1e-4), "mismatch vs JAX reference"

    print("KERNEL_OK")
</pallas_src>

<mosaic_0001>
module attributes {stable_mosaic.version = 11 : i64} {
  func.func @_sepconv_kernel(%arg0: i32, %arg1: i32, %arg2: memref<1x8x384xf32, #tpu.memory_space<vmem>>, %arg3: memref<1x8x8xf32, #tpu.memory_space<vmem>>, %arg4: memref<1x8x49xf32, #tpu.memory_space<vmem>>, %arg5: memref<1x8x8xf32, #tpu.memory_space<vmem>>, %arg6: memref<1x8x384xf32, #tpu.memory_space<vmem>>, %arg7: memref<8x640xf32, #tpu.memory_space<vmem>>, %arg8: memref<8x384xf32, #tpu.memory_space<vmem>>) attributes {dimension_semantics = [#tpu.dimension_semantics<parallel>, #tpu.dimension_semantics<arbitrary>], iteration_bounds = array<i64: 2, 2>, scalar_prefetch = 0 : i64, scratch_operands = 2 : i64, tpu.core_type = #tpu.core_type<tc>, window_params = [{transform_indices = @transform_0, window_bounds = array<i64: 1, 8, 384>}, {transform_indices = @transform_1, window_bounds = array<i64: 1, 8, 8>}, {transform_indices = @transform_2, window_bounds = array<i64: 1, 8, 49>}, {transform_indices = @transform_3, window_bounds = array<i64: 1, 8, 8>}, {transform_indices = @transform_4, window_bounds = array<i64: 1, 8, 384>}]} {
    %c0_i32 = arith.constant 0 : i32
    %0 = arith.cmpi eq, %arg1, %c0_i32 : i32
    %1 = arith.extui %0 : i1 to i32
    %c0_i32_0 = arith.constant 0 : i32
    %2 = arith.cmpi ne, %1, %c0_i32_0 : i32
    scf.if %2 {
      %cst_37 = arith.constant 0.000000e+00 : f32
      %307 = vector.broadcast %cst_37 : f32 to vector<8x384xf32>
      %c0_38 = arith.constant 0 : index
      %c0_39 = arith.constant 0 : index
      %308 = vector.load %arg8[%c0_38, %c0_39] : memref<8x384xf32, #tpu.memory_space<vmem>>, vector<8x384xf32>
      tpu.vector_store %arg8[%c0_38, %c0_39], %307 {strides = array<i32>} : memref<8x384xf32, #tpu.memory_space<vmem>>, vector<8x384xf32>,
      %cst_40 = arith.constant 0.000000e+00 : f32
      %309 = vector.broadcast %cst_40 : f32 to vector<8x128xf32>
      %c0_41 = arith.constant 0 : index
      %c0_42 = arith.constant 0 : index
      %310 = vector.load %arg7[%c0_41, %c0_42] : memref<8x640xf32, #tpu.memory_space<vmem>>, vector<8x128xf32>
      tpu.vector_store %arg7[%c0_41, %c0_42], %309 {strides = array<i32>} : memref<8x640xf32, #tpu.memory_space<vmem>>, vector<8x128xf32>,
      %cst_43 = arith.constant 0.000000e+00 : f32
      %311 = vector.broadcast %cst_43 : f32 to vector<8x128xf32>
      %c0_44 = arith.constant 0 : index
      %c512 = arith.constant 512 : index
      %312 = vector.load %arg7[%c0_44, %c512] : memref<8x640xf32, #tpu.memory_space<vmem>>, vector<8x128xf32>
      tpu.vector_store %arg7[%c0_44, %c512], %311 {strides = array<i32>} : memref<8x640xf32, #tpu.memory_space<vmem>>, vector<8x128xf32>,
    } else {
    }
    %c0 = arith.constant 0 : index
    %c0_1 = arith.constant 0 : index
    %c0_2 = arith.constant 0 : index
    %3 = vector.load %arg3[%c0, %c0_1, %c0_2] : memref<1x8x8xf32, #tpu.memory_space<vmem>>, vector<1x8x8xf32>
    %4 = vector.shape_cast %3 : vector<1x8x8xf32> to vector<8x8xf32>
    %c0_3 = arith.constant 0 : index
    %c0_4 = arith.constant 0 : index
    %c0_5 = arith.constant 0 : index
    %5 = vector.load %arg2[%c0_3, %c0_4, %c0_5] : memref<1x8x384xf32, #tpu.memory_space<vmem>>, vector<1x8x384xf32>
    %6 = vector.shape_cast %5 : vector<1x8x384xf32> to vector<8x384xf32>
    %cst = arith.constant dense<0.000000e+00> : vector<8x384xf32>
    %7 = tpu.matmul %4, %6, %cst {dimension_numbers = #tpu.dot_dimension_numbers<[1], [0], [0], [1], [0, 0, 1, 1], [], []>} : vector<8x8xf32>, vector<8x384xf32>, vector<8x384xf32> -> vector<8x384xf32>
    %cst_6 = arith.constant 0.707106769 : f32
    %8 = vector.broadcast %cst_6 : f32 to vector<8x384xf32>
    %9 = arith.mulf %7, %8 : vector<8x384xf32>
    %10 = math.absf %9 : vector<8x384xf32>
    %cst_7 = arith.constant 0.327591091 : f32
    %11 = vector.broadcast %cst_7 : f32 to vector<8x384xf32>
    %12 = arith.mulf %11, %10 : vector<8x384xf32>
    %cst_8 = arith.constant 1.000000e+00 : f32
    %13 = vector.broadcast %cst_8 : f32 to vector<8x384xf32>
    %14 = arith.addf %13, %12 : vector<8x384xf32>
    %cst_9 = arith.constant 1.000000e+00 : f32
    %15 = vector.broadcast %cst_9 : f32 to vector<8x384xf32>
    %16 = arith.divf %15, %14 : vector<8x384xf32>
    %cst_10 = arith.constant 1.06140542 : f32
    %17 = vector.broadcast %cst_10 : f32 to vector<8x384xf32>
    %18 = arith.mulf %16, %17 : vector<8x384xf32>
    %cst_11 = arith.constant -1.45315206 : f32
    %19 = vector.broadcast %cst_11 : f32 to vector<8x384xf32>
    %20 = arith.addf %19, %18 : vector<8x384xf32>
    %21 = arith.mulf %16, %20 : vector<8x384xf32>
    %cst_12 = arith.constant 1.42141378 : f32
    %22 = vector.broadcast %cst_12 : f32 to vector<8x384xf32>
    %23 = arith.addf %22, %21 : vector<8x384xf32>
    %24 = arith.mulf %16, %23 : vector<8x384xf32>
    %cst_13 = arith.constant -0.284496725 : f32
    %25 = vector.broadcast %cst_13 : f32 to vector<8x384xf32>
    %26 = arith.addf %25, %24 : vector<8x384xf32>
    %27 = arith.mulf %16, %26 : vector<8x384xf32>
    %cst_14 = arith.constant 0.254829586 : f32
    %28 = vector.broadcast %cst_14 : f32 to vector<8x384xf32>
    %29 = arith.addf %28, %27 : vector<8x384xf32>
    %30 = arith.mulf %16, %29 : vector<8x384xf32>
    %cst_15 = arith.constant 0.000000e+00 : f32
    %31 = vector.broadcast %cst_15 : f32 to vector<8x384xf32>
    %32 = arith.subf %31, %10 : vector<8x384xf32>
    %33 = arith.mulf %32, %10 : vector<8x384xf32>
    %34 = math.exp %33 : vector<8x384xf32>
    %35 = arith.mulf %30, %34 : vector<8x384xf32>
    %cst_16 = arith.constant 1.000000e+00 : f32
    %36 = vector.broadcast %cst_16 : f32 to vector<8x384xf32>
    %37 = arith.subf %36, %35 : vector<8x384xf32>
    %cst_17 = arith.constant 0.000000e+00 : f32
    %38 = vector.broadcast %cst_17 : f32 to vector<8x384xf32>
    %39 = arith.cmpf oge, %9, %38 : vector<8x384xf32>
    %cst_18 = arith.constant 0.000000e+00 : f32
    %40 = vector.broadcast %cst_18 : f32 to vector<8x384xf32>
    %41 = arith.subf %40, %37 : vector<8x384xf32>
    %42 = arith.select %39, %37, %41 : vector<8x384xi1>, vector<8x384xf32>
    %cst_19 = arith.constant 5.000000e-01 : f32
    %43 = vector.broadcast %cst_19 : f32 to vector<8x384xf32>
    %44 = arith.mulf %43, %7 : vector<8x384xf32>
    %cst_20 = arith.constant 1.000000e+00 : f32
    %45 = vector.broadcast %cst_20 : f32 to vector<8x384xf32>
    %46 = arith.addf %45, %42 : vector<8x384xf32>
    %47 = arith.mulf %44, %46 : vector<8x384xf32>
    %c0_21 = arith.constant 0 : index
    %c128 = arith.constant 128 : index
    %48 = vector.load %arg7[%c0_21, %c128] : memref<8x640xf32, #tpu.memory_space<vmem>>, vector<8x384xf32>
    tpu.vector_store %arg7[%c0_21, %c128], %47 {strides = array<i32>} : memref<8x640xf32, #tpu.memory_space<vmem>>, vector<8x384xf32>,
    %c0_22 = arith.constant 0 : index
    %c0_23 = arith.constant 0 : index
    %49 = vector.load %arg7[%c0_22, %c0_23] : memref<8x640xf32, #tpu.memory_space<vmem>>, vector<8x640xf32>
    %c0_24 = arith.constant 0 : index
    %c0_25 = arith.constant 0 : index
    %c0_26 = arith.constant 0 : index
    %50 = vector.load %arg4[%c0_24, %c0_25, %c0_26] : memref<1x8x49xf32, #tpu.memory_space<vmem>>, vector<1x8x49xf32>
    %51 = vector.shape_cast %50 : vector<1x8x49xf32> to vector<8x49xf32>
    %cst_27 = arith.constant 0.000000e+00 : f32
    %52 = vector.broadcast %cst_27 : f32 to vector<8x384xf32>
    %53 = vector.extract_strided_slice %49 {offsets = [0, 68], sizes = [8, 384], strides = [1, 1]} : vector<8x640xf32> to vector<8x384xf32>
    %54 = vector.extract_strided_slice %51 {offsets = [0, 0], sizes = [8, 1], strides = [1, 1]} : vector<8x49xf32> to vector<8x1xf32>
    %55 = vector.broadcast %54 : vector<8x1xf32> to vector<8x384xf32>
    %56 = arith.mulf %53, %55 : vector<8x384xf32>
    %57 = arith.addf %52, %56 : vector<8x384xf32>
    %58 = vector.extract_strided_slice %49 {offsets = [0, 69], sizes = [8, 384], strides = [1, 1]} : vector<8x640xf32> to vector<8x384xf32>
    %59 = vector.extract_strided_slice %51 {offsets = [0, 1], sizes = [8, 1], strides = [1, 1]} : vector<8x49xf32> to vector<8x1xf32>
    %60 = vector.broadcast %59 : vector<8x1xf32> to vector<8x384xf32>
    %61 = arith.mulf %58, %60 : vector<8x384xf32>
    %62 = arith.addf %57, %61 : vector<8x384xf32>
    %63 = vector.extract_strided_slice %49 {offsets = [0, 70], sizes = [8, 384], strides = [1, 1]} : vector<8x640xf32> to vector<8x384xf32>
    %64 = vector.extract_strided_slice %51 {offsets = [0, 2], sizes = [8, 1], strides = [1, 1]} : vector<8x49xf32> to vector<8x1xf32>
    %65 = vector.broadcast %64 : vector<8x1xf32> to vector<8x384xf32>
    %66 = arith.mulf %63, %65 : vector<8x384xf32>
    %67 = arith.addf %62, %66 : vector<8x384xf32>
    %68 = vector.extract_strided_slice %49 {offsets = [0, 71], sizes = [8, 384], strides = [1, 1]} : vector<8x640xf32> to vector<8x384xf32>
    %69 = vector.extract_strided_slice %51 {offsets = [0, 3], sizes = [8, 1], strides = [1, 1]} : vector<8x49xf32> to vector<8x1xf32>
    %70 = vector.broadcast %69 : vector<8x1xf32> to vector<8x384xf32>
    %71 = arith.mulf %68, %70 : vector<8x384xf32>
    %72 = arith.addf %67, %71 : vector<8x384xf32>
    %73 = vector.extract_strided_slice %49 {offsets = [0, 72], sizes = [8, 384], strides = [1, 1]} : vector<8x640xf32> to vector<8x384xf32>
    %74 = vector.extract_strided_slice %51 {offsets = [0, 4], sizes = [8, 1], strides = [1, 1]} : vector<8x49xf32> to vector<8x1xf32>
    %75 = vector.broadcast %74 : vector<8x1xf32> to vector<8x384xf32>
    %76 = arith.mulf %73, %75 : vector<8x384xf32>
    %77 = arith.addf %72, %76 : vector<8x384xf32>
    %78 = vector.extract_strided_slice %49 {offsets = [0, 73], sizes = [8, 384], strides = [1, 1]} : vector<8x640xf32> to vector<8x384xf32>
    %79 = vector.extract_strided_slice %51 {offsets = [0, 5], sizes = [8, 1], strides = [1, 1]} : vector<8x49xf32> to vector<8x1xf32>
    %80 = vector.broadcast %79 : vector<8x1xf32> to vector<8x384xf32>
    %81 = arith.mulf %78, %80 : vector<8x384xf32>
    %82 = arith.addf %77, %81 : vector<8x384xf32>
    %83 = vector.extract_strided_slice %49 {offsets = [0, 74], sizes = [8, 384], strides = [1, 1]} : vector<8x640xf32> to vector<8x384xf32>
    %84 = vector.extract_strided_slice %51 {offsets = [0, 6], sizes = [8, 1], strides = [1, 1]} : vector<8x49xf32> to vector<8x1xf32>
    %85 = vector.broadcast %84 : vector<8x1xf32> to vector<8x384xf32>
    %86 = arith.mulf %83, %85 : vector<8x384xf32>
    %87 = arith.addf %82, %86 : vector<8x384xf32>
    %88 = vector.extract_strided_slice %49 {offsets = [0, 87], sizes = [8, 384], strides = [1, 1]} : vector<8x640xf32> to vector<8x384xf32>
    %89 = vector.extract_strided_slice %51 {offsets = [0, 7], sizes = [8, 1], strides = [1, 1]} : vector<8x49xf32> to vector<8x1xf32>
    %90 = vector.broadcast %89 : vector<8x1xf32> to vector<8x384xf32>
    %91 = arith.mulf %88, %90 : vector<8x384xf32>
    %92 = arith.addf %87, %91 : vector<8x384xf32>
    %93 = vector.extract_strided_slice %49 {offsets = [0, 88], sizes = [8, 384], strides = [1, 1]} : vector<8x640xf32> to vector<8x384xf32>
    %94 = vector.extract_strided_slice %51 {offsets = [0, 8], sizes = [8, 1], strides = [1, 1]} : vector<8x49xf32> to vector<8x1xf32>
    %95 = vector.broadcast %94 : vector<8x1xf32> to vector<8x384xf32>
    %96 = arith.mulf %93, %95 : vector<8x384xf32>
    %97 = arith.addf %92, %96 : vector<8x384xf32>
    %98 = vector.extract_strided_slice %49 {offsets = [0, 89], sizes = [8, 384], strides = [1, 1]} : vector<8x640xf32> to vector<8x384xf32>
    %99 = vector.extract_strided_slice %51 {offsets = [0, 9], sizes = [8, 1], strides = [1, 1]} : vector<8x49xf32> to vector<8x1xf32>
    %100 = vector.broadcast %99 : vector<8x1xf32> to vector<8x384xf32>
    %101 = arith.mulf %98, %100 : vector<8x384xf32>
    %102 = arith.addf %97, %101 : vector<8x384xf32>
    %103 = vector.extract_strided_slice %49 {offsets = [0, 90], sizes = [8, 384], strides = [1, 1]} : vector<8x640xf32> to vector<8x384xf32>
    %104 = vector.extract_strided_slice %51 {offsets = [0, 10], sizes = [8, 1], strides = [1, 1]} : vector<8x49xf32> to vector<8x1xf32>
    %105 = vector.broadcast %104 : vector<8x1xf32> to vector<8x384xf32>
    %106 = arith.mulf %103, %105 : vector<8x384xf32>
    %107 = arith.addf %102, %106 : vector<8x384xf32>
    %108 = vector.extract_strided_slice %49 {offsets = [0, 91], sizes = [8, 384], strides = [1, 1]} : vector<8x640xf32> to vector<8x384xf32>
    %109 = vector.extract_strided_slice %51 {offsets = [0, 11], sizes = [8, 1], strides = [1, 1]} : vector<8x49xf32> to vector<8x1xf32>
    %110 = vector.broadcast %109 : vector<8x1xf32> to vector<8x384xf32>
    %111 = arith.mulf %108, %110 : vector<8x384xf32>
    %112 = arith.addf %107, %111 : vector<8x384xf32>
    %113 = vector.extract_strided_slice %49 {offsets = [0, 92], sizes = [8, 384], strides = [1, 1]} : vector<8x640xf32> to vector<8x384xf32>
    %114 = vector.extract_strided_slice %51 {offsets = [0, 12], sizes = [8, 1], strides = [1, 1]} : vector<8x49xf32> to vector<8x1xf32>
    %115 = vector.broadcast %114 : vector<8x1xf32> to vector<8x384xf32>
    %116 = arith.mulf %113, %115 : vector<8x384xf32>
    %117 = arith.addf %112, %116 : vector<8x384xf32>
    %118 = vector.extract_strided_slice %49 {offsets = [0, 93], sizes = [8, 384], strides = [1, 1]} : vector<8x640xf32> to vector<8x384xf32>
    %119 = vector.extract_strided_slice %51 {offsets = [0, 13], sizes = [8, 1], strides = [1, 1]} : vector<8x49xf32> to vector<8x1xf32>
    %120 = vector.broadcast %119 : vector<8x1xf32> to vector<8x384xf32>
    %121 = arith.mulf %118, %120 : vector<8x384xf32>
    %122 = arith.addf %117, %121 : vector<8x384xf32>
    %123 = vector.extract_strided_slice %49 {offsets = [0, 106], sizes = [8, 384], strides = [1, 1]} : vector<8x640xf32> to vector<8x384xf32>
    %124 = vector.extract_strided_slice %51 {offsets = [0, 14], sizes = [8, 1], strides = [1, 1]} : vector<8x49xf32> to vector<8x1xf32>
    %125 = vector.broadcast %124 : vector<8x1xf32> to vector<8x384xf32>
    %126 = arith.mulf %123, %125 : vector<8x384xf32>
    %127 = arith.addf %122, %126 : vector<8x384xf32>
    %128 = vector.extract_strided_slice %49 {offsets = [0, 107], sizes = [8, 384], strides = [1, 1]} : vector<8x640xf32> to vector<8x384xf32>
    %129 = vector.extract_strided_slice %51 {offsets = [0, 15], sizes = [8, 1], strides = [1, 1]} : vector<8x49xf32> to vector<8x1xf32>
    %130 = vector.broadcast %129 : vector<8x1xf32> to vector<8x384xf32>
    %131 = arith.mulf %128, %130 : vector<8x384xf32>
    %132 = arith.addf %127, %131 : vector<8x384xf32>
    %133 = vector.extract_strided_slice %49 {offsets = [0, 108], sizes = [8, 384], strides = [1, 1]} : vector<8x640xf32> to vector<8x384xf32>
    %134 = vector.extract_strided_slice %51 {offsets = [0, 16], sizes = [8, 1], strides = [1, 1]} : vector<8x49xf32> to vector<8x1xf32>
    %135 = vector.broadcast %134 : vector<8x1xf32> to vector<8x384xf32>
    %136 = arith.mulf %133, %135 : vector<8x384xf32>
    %137 = arith.addf %132, %136 : vector<8x384xf32>
    %138 = vector.extract_strided_slice %49 {offsets = [0, 109], sizes = [8, 384], strides = [1, 1]} : vector<8x640xf32> to vector<8x384xf32>
    %139 = vector.extract_strided_slice %51 {offsets = [0, 17], sizes = [8, 1], strides = [1, 1]} : vector<8x49xf32> to vector<8x1xf32>
    %140 = vector.broadcast %139 : vector<8x1xf32> to vector<8x384xf32>
    %141 = arith.mulf %138, %140 : vector<8x384xf32>
    %142 = arith.addf %137, %141 : vector<8x384xf32>
    %143 = vector.extract_strided_slice %49 {offsets = [0, 110], sizes = [8, 384], strides = [1, 1]} : vector<8x640xf32> to vector<8x384xf32>
    %144 = vector.extract_strided_slice %51 {offsets = [0, 18], sizes = [8, 1], strides = [1, 1]} : vector<8x49xf32> to vector<8x1xf32>
    %145 = vector.broadcast %144 : vector<8x1xf32> to vector<8x384xf32>
    %146 = arith.mulf %143, %145 : vector<8x384xf32>
    %147 = arith.addf %142, %146 : vector<8x384xf32>
    %148 = vector.extract_strided_slice %49 {offsets = [0, 111], sizes = [8, 384], strides = [1, 1]} : vector<8x640xf32> to vector<8x384xf32>
    %149 = vector.extract_strided_slice %51 {offsets = [0, 19], sizes = [8, 1], strides = [1, 1]} : vector<8x49xf32> to vector<8x1xf32>
    %150 = vector.broadcast %149 : vector<8x1xf32> to vector<8x384xf32>
    %151 = arith.mulf %148, %150 : vector<8x384xf32>
    %152 = arith.addf %147, %151 : vector<8x384xf32>
    %153 = vector.extract_strided_slice %49 {offsets = [0, 112], sizes = [8, 384], strides = [1, 1]} : vector<8x640xf32> to vector<8x384xf32>
    %154 = vector.extract_strided_slice %51 {offsets = [0, 20], sizes = [8, 1], strides = [1, 1]} : vector<8x49xf32> to vector<8x1xf32>
    %155 = vector.broadcast %154 : vector<8x1xf32> to vector<8x384xf32>
    %156 = arith.mulf %153, %155 : vector<8x384xf32>
    %157 = arith.addf %152, %156 : vector<8x384xf32>
    %158 = vector.extract_strided_slice %49 {offsets = [0, 125], sizes = [8, 384], strides = [1, 1]} : vector<8x640xf32> to vector<8x384xf32>
    %159 = vector.extract_strided_slice %51 {offsets = [0, 21], sizes = [8, 1], strides = [1, 1]} : vector<8x49xf32> to vector<8x1xf32>
    %160 = vector.broadcast %159 : vector<8x1xf32> to vector<8x384xf32>
    %161 = arith.mulf %158, %160 : vector<8x384xf32>
    %162 = arith.addf %157, %161 : vector<8x384xf32>
    %163 = vector.extract_strided_slice %49 {offsets = [0, 126], sizes = [8, 384], strides = [1, 1]} : vector<8x640xf32> to vector<8x384xf32>
    %164 = vector.extract_strided_slice %51 {offsets = [0, 22], sizes = [8, 1], strides = [1, 1]} : vector<8x49xf32> to vector<8x1xf32>
    %165 = vector.broadcast %164 : vector<8x1xf32> to vector<8x384xf32>
    %166 = arith.mulf %163, %165 : vector<8x384xf32>
    %167 = arith.addf %162, %166 : vector<8x384xf32>
    %168 = vector.extract_strided_slice %49 {offsets = [0, 127], sizes = [8, 384], strides = [1, 1]} : vector<8x640xf32> to vector<8x384xf32>
    %169 = vector.extract_strided_slice %51 {offsets = [0, 23], sizes = [8, 1], strides = [1, 1]} : vector<8x49xf32> to vector<8x1xf32>
    %170 = vector.broadcast %169 : vector<8x1xf32> to vector<8x384xf32>
    %171 = arith.mulf %168, %170 : vector<8x384xf32>
    %172 = arith.addf %167, %171 : vector<8x384xf32>
    %173 = vector.extract_strided_slice %49 {offsets = [0, 128], sizes = [8, 384], strides = [1, 1]} : vector<8x640xf32> to vector<8x384xf32>
    %174 = vector.extract_strided_slice %51 {offsets = [0, 24], sizes = [8, 1], strides = [1, 1]} : vector<8x49xf32> to vector<8x1xf32>
    %175 = vector.broadcast %174 : vector<8x1xf32> to vector<8x384xf32>
    %176 = arith.mulf %173, %175 : vector<8x384xf32>
    %177 = arith.addf %172, %176 : vector<8x384xf32>
    %178 = vector.extract_strided_slice %49 {offsets = [0, 129], sizes = [8, 384], strides = [1, 1]} : vector<8x640xf32> to vector<8x384xf32>
    %179 = vector.extract_strided_slice %51 {offsets = [0, 25], sizes = [8, 1], strides = [1, 1]} : vector<8x49xf32> to vector<8x1xf32>
    %180 = vector.broadcast %179 : vector<8x1xf32> to vector<8x384xf32>
    %181 = arith.mulf %178, %180 : vector<8x384xf32>
    %182 = arith.addf %177, %181 : vector<8x384xf32>
    %183 = vector.extract_strided_slice %49 {offsets = [0, 130], sizes = [8, 384], strides = [1, 1]} : vector<8x640xf32> to vector<8x384xf32>
    %184 = vector.extract_strided_slice %51 {offsets = [0, 26], sizes = [8, 1], strides = [1, 1]} : vector<8x49xf32> to vector<8x1xf32>
    %185 = vector.broadcast %184 : vector<8x1xf32> to vector<8x384xf32>
    %186 = arith.mulf %183, %185 : vector<8x384xf32>
    %187 = arith.addf %182, %186 : vector<8x384xf32>
    %188 = vector.extract_strided_slice %49 {offsets = [0, 131], sizes = [8, 384], strides = [1, 1]} : vector<8x640xf32> to vector<8x384xf32>
    %189 = vector.extract_strided_slice %51 {offsets = [0, 27], sizes = [8, 1], strides = [1, 1]} : vector<8x49xf32> to vector<8x1xf32>
    %190 = vector.broadcast %189 : vector<8x1xf32> to vector<8x384xf32>
    %191 = arith.mulf %188, %190 : vector<8x384xf32>
    %192 = arith.addf %187, %191 : vector<8x384xf32>
    %193 = vector.extract_strided_slice %49 {offsets = [0, 144], sizes = [8, 384], strides = [1, 1]} : vector<8x640xf32> to vector<8x384xf32>
    %194 = vector.extract_strided_slice %51 {offsets = [0, 28], sizes = [8, 1], strides = [1, 1]} : vector<8x49xf32> to vector<8x1xf32>
    %195 = vector.broadcast %194 : vector<8x1xf32> to vector<8x384xf32>
    %196 = arith.mulf %193, %195 : vector<8x384xf32>
    %197 = arith.addf %192, %196 : vector<8x384xf32>
    %198 = vector.extract_strided_slice %49 {offsets = [0, 145], sizes = [8, 384], strides = [1, 1]} : vector<8x640xf32> to vector<8x384xf32>
    %199 = vector.extract_strided_slice %51 {offsets = [0, 29], sizes = [8, 1], strides = [1, 1]} : vector<8x49xf32> to vector<8x1xf32>
    %200 = vector.broadcast %199 : vector<8x1xf32> to vector<8x384xf32>
    %201 = arith.mulf %198, %200 : vector<8x384xf32>
    %202 = arith.addf %197, %201 : vector<8x384xf32>
    %203 = vector.extract_strided_slice %49 {offsets = [0, 146], sizes = [8, 384], strides = [1, 1]} : vector<8x640xf32> to vector<8x384xf32>
    %204 = vector.extract_strided_slice %51 {offsets = [0, 30], sizes = [8, 1], strides = [1, 1]} : vector<8x49xf32> to vector<8x1xf32>
    %205 = vector.broadcast %204 : vector<8x1xf32> to vector<8x384xf32>
    %206 = arith.mulf %203, %205 : vector<8x384xf32>
    %207 = arith.addf %202, %206 : vector<8x384xf32>
    %208 = vector.extract_strided_slice %49 {offsets = [0, 147], sizes = [8, 384], strides = [1, 1]} : vector<8x640xf32> to vector<8x384xf32>
    %209 = vector.extract_strided_slice %51 {offsets = [0, 31], sizes = [8, 1], strides = [1, 1]} : vector<8x49xf32> to vector<8x1xf32>
    %210 = vector.broadcast %209 : vector<8x1xf32> to vector<8x384xf32>
    %211 = arith.mulf %208, %210 : vector<8x384xf32>
    %212 = arith.addf %207, %211 : vector<8x384xf32>
    %213 = vector.extract_strided_slice %49 {offsets = [0, 148], sizes = [8, 384], strides = [1, 1]} : vector<8x640xf32> to vector<8x384xf32>
    %214 = vector.extract_strided_slice %51 {offsets = [0, 32], sizes = [8, 1], strides = [1, 1]} : vector<8x49xf32> to vector<8x1xf32>
    %215 = vector.broadcast %214 : vector<8x1xf32> to vector<8x384xf32>
    %216 = arith.mulf %213, %215 : vector<8x384xf32>
    %217 = arith.addf %212, %216 : vector<8x384xf32>
    %218 = vector.extract_strided_slice %49 {offsets = [0, 149], sizes = [8, 384], strides = [1, 1]} : vector<8x640xf32> to vector<8x384xf32>
    %219 = vector.extract_strided_slice %51 {offsets = [0, 33], sizes = [8, 1], strides = [1, 1]} : vector<8x49xf32> to vector<8x1xf32>
    %220 = vector.broadcast %219 : vector<8x1xf32> to vector<8x384xf32>
    %221 = arith.mulf %218, %220 : vector<8x384xf32>
    %222 = arith.addf %217, %221 : vector<8x384xf32>
    %223 = vector.extract_strided_slice %49 {offsets = [0, 150], sizes = [8, 384], strides = [1, 1]} : vector<8x640xf32> to vector<8x384xf32>
    %224 = vector.extract_strided_slice %51 {offsets = [0, 34], sizes = [8, 1], strides = [1, 1]} : vector<8x49xf32> to vector<8x1xf32>
    %225 = vector.broadcast %224 : vector<8x1xf32> to vector<8x384xf32>
    %226 = arith.mulf %223, %225 : vector<8x384xf32>
    %227 = arith.addf %222, %226 : vector<8x384xf32>
    %228 = vector.extract_strided_slice %49 {offsets = [0, 163], sizes = [8, 384], strides = [1, 1]} : vector<8x640xf32> to vector<8x384xf32>
    %229 = vector.extract_strided_slice %51 {offsets = [0, 35], sizes = [8, 1], strides = [1, 1]} : vector<8x49xf32> to vector<8x1xf32>
    %230 = vector.broadcast %229 : vector<8x1xf32> to vector<8x384xf32>
    %231 = arith.mulf %228, %230 : vector<8x384xf32>
    %232 = arith.addf %227, %231 : vector<8x384xf32>
    %233 = vector.extract_strided_slice %49 {offsets = [0, 164], sizes = [8, 384], strides = [1, 1]} : vector<8x640xf32> to vector<8x384xf32>
    %234 = vector.extract_strided_slice %51 {offsets = [0, 36], sizes = [8, 1], strides = [1, 1]} : vector<8x49xf32> to vector<8x1xf32>
    %235 = vector.broadcast %234 : vector<8x1xf32> to vector<8x384xf32>
    %236 = arith.mulf %233, %235 : vector<8x384xf32>
    %237 = arith.addf %232, %236 : vector<8x384xf32>
    %238 = vector.extract_strided_slice %49 {offsets = [0, 165], sizes = [8, 384], strides = [1, 1]} : vector<8x640xf32> to vector<8x384xf32>
    %239 = vector.extract_strided_slice %51 {offsets = [0, 37], sizes = [8, 1], strides = [1, 1]} : vector<8x49xf32> to vector<8x1xf32>
    %240 = vector.broadcast %239 : vector<8x1xf32> to vector<8x384xf32>
    %241 = arith.mulf %238, %240 : vector<8x384xf32>
    %242 = arith.addf %237, %241 : vector<8x384xf32>
    %243 = vector.extract_strided_slice %49 {offsets = [0, 166], sizes = [8, 384], strides = [1, 1]} : vector<8x640xf32> to vector<8x384xf32>
    %244 = vector.extract_strided_slice %51 {offsets = [0, 38], sizes = [8, 1], strides = [1, 1]} : vector<8x49xf32> to vector<8x1xf32>
    %245 = vector.broadcast %244 : vector<8x1xf32> to vector<8x384xf32>
    %246 = arith.mulf %243, %245 : vector<8x384xf32>
    %247 = arith.addf %242, %246 : vector<8x384xf32>
    %248 = vector.extract_strided_slice %49 {offsets = [0, 167], sizes = [8, 384], strides = [1, 1]} : vector<8x640xf32> to vector<8x384xf32>
    %249 = vector.extract_strided_slice %51 {offsets = [0, 39], sizes = [8, 1], strides = [1, 1]} : vector<8x49xf32> to vector<8x1xf32>
    %250 = vector.broadcast %249 : vector<8x1xf32> to vector<8x384xf32>
    %251 = arith.mulf %248, %250 : vector<8x384xf32>
    %252 = arith.addf %247, %251 : vector<8x384xf32>
    %253 = vector.extract_strided_slice %49 {offsets = [0, 168], sizes = [8, 384], strides = [1, 1]} : vector<8x640xf32> to vector<8x384xf32>
    %254 = vector.extract_strided_slice %51 {offsets = [0, 40], sizes = [8, 1], strides = [1, 1]} : vector<8x49xf32> to vector<8x1xf32>
    %255 = vector.broadcast %254 : vector<8x1xf32> to vector<8x384xf32>
    %256 = arith.mulf %253, %255 : vector<8x384xf32>
    %257 = arith.addf %252, %256 : vector<8x384xf32>
    %258 = vector.extract_strided_slice %49 {offsets = [0, 169], sizes = [8, 384], strides = [1, 1]} : vector<8x640xf32> to vector<8x384xf32>
    %259 = vector.extract_strided_slice %51 {offsets = [0, 41], sizes = [8, 1], strides = [1, 1]} : vector<8x49xf32> to vector<8x1xf32>
    %260 = vector.broadcast %259 : vector<8x1xf32> to vector<8x384xf32>
    %261 = arith.mulf %258, %260 : vector<8x384xf32>
    %262 = arith.addf %257, %261 : vector<8x384xf32>
    %263 = vector.extract_strided_slice %49 {offsets = [0, 182], sizes = [8, 384], strides = [1, 1]} : vector<8x640xf32> to vector<8x384xf32>
    %264 = vector.extract_strided_slice %51 {offsets = [0, 42], sizes = [8, 1], strides = [1, 1]} : vector<8x49xf32> to vector<8x1xf32>
    %265 = vector.broadcast %264 : vector<8x1xf32> to vector<8x384xf32>
    %266 = arith.mulf %263, %265 : vector<8x384xf32>
    %267 = arith.addf %262, %266 : vector<8x384xf32>
    %268 = vector.extract_strided_slice %49 {offsets = [0, 183], sizes = [8, 384], strides = [1, 1]} : vector<8x640xf32> to vector<8x384xf32>
    %269 = vector.extract_strided_slice %51 {offsets = [0, 43], sizes = [8, 1], strides = [1, 1]} : vector<8x49xf32> to vector<8x1xf32>
    %270 = vector.broadcast %269 : vector<8x1xf32> to vector<8x384xf32>
    %271 = arith.mulf %268, %270 : vector<8x384xf32>
    %272 = arith.addf %267, %271 : vector<8x384xf32>
    %273 = vector.extract_strided_slice %49 {offsets = [0, 184], sizes = [8, 384], strides = [1, 1]} : vector<8x640xf32> to vector<8x384xf32>
    %274 = vector.extract_strided_slice %51 {offsets = [0, 44], sizes = [8, 1], strides = [1, 1]} : vector<8x49xf32> to vector<8x1xf32>
    %275 = vector.broadcast %274 : vector<8x1xf32> to vector<8x384xf32>
    %276 = arith.mulf %273, %275 : vector<8x384xf32>
    %277 = arith.addf %272, %276 : vector<8x384xf32>
    %278 = vector.extract_strided_slice %49 {offsets = [0, 185], sizes = [8, 384], strides = [1, 1]} : vector<8x640xf32> to vector<8x384xf32>
    %279 = vector.extract_strided_slice %51 {offsets = [0, 45], sizes = [8, 1], strides = [1, 1]} : vector<8x49xf32> to vector<8x1xf32>
    %280 = vector.broadcast %279 : vector<8x1xf32> to vector<8x384xf32>
    %281 = arith.mulf %278, %280 : vector<8x384xf32>
    %282 = arith.addf %277, %281 : vector<8x384xf32>
    %283 = vector.extract_strided_slice %49 {offsets = [0, 186], sizes = [8, 384], strides = [1, 1]} : vector<8x640xf32> to vector<8x384xf32>
    %284 = vector.extract_strided_slice %51 {offsets = [0, 46], sizes = [8, 1], strides = [1, 1]} : vector<8x49xf32> to vector<8x1xf32>
    %285 = vector.broadcast %284 : vector<8x1xf32> to vector<8x384xf32>
    %286 = arith.mulf %283, %285 : vector<8x384xf32>
    %287 = arith.addf %282, %286 : vector<8x384xf32>
    %288 = vector.extract_strided_slice %49 {offsets = [0, 187], sizes = [8, 384], strides = [1, 1]} : vector<8x640xf32> to vector<8x384xf32>
    %289 = vector.extract_strided_slice %51 {offsets = [0, 47], sizes = [8, 1], strides = [1, 1]} : vector<8x49xf32> to vector<8x1xf32>
    %290 = vector.broadcast %289 : vector<8x1xf32> to vector<8x384xf32>
    %291 = arith.mulf %288, %290 : vector<8x384xf32>
    %292 = arith.addf %287, %291 : vector<8x384xf32>
    %293 = vector.extract_strided_slice %49 {offsets = [0, 188], sizes = [8, 384], strides = [1, 1]} : vector<8x640xf32> to vector<8x384xf32>
    %294 = vector.extract_strided_slice %51 {offsets = [0, 48], sizes = [8, 1], strides = [1, 1]} : vector<8x49xf32> to vector<8x1xf32>
    %295 = vector.broadcast %294 : vector<8x1xf32> to vector<8x384xf32>
    %296 = arith.mulf %293, %295 : vector<8x384xf32>
    %297 = arith.addf %292, %296 : vector<8x384xf32>
    %c0_28 = arith.constant 0 : index
    %c0_29 = arith.constant 0 : index
    %298 = vector.load %arg8[%c0_28, %c0_29] : memref<8x384xf32, #tpu.memory_space<vmem>>, vector<8x384xf32>
    %c0_30 = arith.constant 0 : index
    %c0_31 = arith.constant 0 : index
    %c0_32 = arith.constant 0 : index
    %299 = vector.load %arg5[%c0_30, %c0_31, %c0_32] : memref<1x8x8xf32, #tpu.memory_space<vmem>>, vector<1x8x8xf32>
    %300 = vector.shape_cast %299 : vector<1x8x8xf32> to vector<8x8xf32>
    %cst_33 = arith.constant dense<0.000000e+00> : vector<8x384xf32>
    %301 = tpu.matmul %300, %297, %cst_33 {dimension_numbers = #tpu.dot_dimension_numbers<[1], [0], [0], [1], [0, 0, 1, 1], [], []>} : vector<8x8xf32>, vector<8x384xf32>, vector<8x384xf32> -> vector<8x384xf32>
    %302 = arith.addf %298, %301 : vector<8x384xf32>
    %c0_34 = arith.constant 0 : index
    %c0_35 = arith.constant 0 : index
    %303 = vector.load %arg8[%c0_34, %c0_35] : memref<8x384xf32, #tpu.memory_space<vmem>>, vector<8x384xf32>
    tpu.vector_store %arg8[%c0_34, %c0_35], %302 {strides = array<i32>} : memref<8x384xf32, #tpu.memory_space<vmem>>, vector<8x384xf32>,
    %c1_i32 = arith.constant 1 : i32
    %304 = arith.cmpi eq, %arg1, %c1_i32 : i32
    %305 = arith.extui %304 : i1 to i32
    %c0_i32_36 = arith.constant 0 : i32
    %306 = arith.cmpi ne, %305, %c0_i32_36 : i32
    scf.if %306 {
      %c0_37 = arith.constant 0 : index
      %c0_38 = arith.constant 0 : index
      %307 = vector.load %arg8[%c0_37, %c0_38] : memref<8x384xf32, #tpu.memory_space<vmem>>, vector<8x384xf32>
      %c0_39 = arith.constant 0 : index
      %c0_40 = arith.constant 0 : index
      %c0_41 = arith.constant 0 : index
      %308 = vector.load %arg6[%c0_39, %c0_40, %c0_41] : memref<1x8x384xf32, #tpu.memory_space<vmem>>, vector<1x8x384xf32>
      %309 = vector.shape_cast %308 : vector<1x8x384xf32> to vector<8x384xf32>
      %310 = vector.shape_cast %307 : vector<8x384xf32> to vector<1x8x384xf32>
      tpu.vector_store %arg6[%c0_39, %c0_40, %c0_41], %310 {strides = array<i32>} : memref<1x8x384xf32, #tpu.memory_space<vmem>>, vector<1x8x384xf32>,
    } else {
    }
    return
  }
  func.func @transform_0(%arg0: i32, %arg1: i32) -> (i32, i32, i32) {
    %c0_i32 = arith.constant 0 : i32
    %c0_i32_0 = arith.constant 0 : i32
    %c0_i32_1 = arith.constant 0 : i32
    return %arg0, %c0_i32, %c0_i32_0 : i32, i32, i32
  }
  func.func @transform_1(%arg0: i32, %arg1: i32) -> (i32, i32, i32) {
    %c0_i32 = arith.constant 0 : i32
    %c0_i32_0 = arith.constant 0 : i32
    %c0_i32_1 = arith.constant 0 : i32
    return %arg1, %c0_i32, %c0_i32_0 : i32, i32, i32
  }
  func.func @transform_2(%arg0: i32, %arg1: i32) -> (i32, i32, i32) {
    %c0_i32 = arith.constant 0 : i32
    %c0_i32_0 = arith.constant 0 : i32
    %c0_i32_1 = arith.constant 0 : i32
    return %arg1, %c0_i32, %c0_i32_0 : i32, i32, i32
  }
  func.func @transform_3(%arg0: i32, %arg1: i32) -> (i32, i32, i32) {
    %c0_i32 = arith.constant 0 : i32
    %c0_i32_0 = arith.constant 0 : i32
    %c0_i32_1 = arith.constant 0 : i32
    return %arg1, %c0_i32, %c0_i32_0 : i32, i32, i32
  }
  func.func @transform_4(%arg0: i32, %arg1: i32) -> (i32, i32, i32) {
    %c0_i32 = arith.constant 0 : i32
    %c0_i32_0 = arith.constant 0 : i32
    %c0_i32_1 = arith.constant 0 : i32
    return %arg0, %c0_i32, %c0_i32_0 : i32, i32, i32
  }
}

</mosaic_0001>

<bundles_post_ra>
// kernel: sepconv_forward.1
= control target key start
LH: loop header
LB: loop body
LE: loop exit
PB: predicated region body
PF: predicated region fallthrough
CT: control target
= control target key end

     0   :  { %s2743_s15 = smov 0   ;;  %s2745_s16 = smov 0   ;;  %s4228_s0 = inlined_call_operand.vmem [shape: f32[2,8,384], index: 0, kind: input, shape index: {}]   ;;  %s4229_s1 = inlined_call_operand.vmem [shape: f32[2,8,8], index: 1, kind: input, shape index: {}]   ;;  %s4230_s2 = inlined_call_operand.vmem [shape: f32[2,8,49], index: 2, kind: input, shape index: {}]   ;;  %s4231_s3 = inlined_call_operand.vmem [shape: f32[2,8,8], index: 3, kind: input, shape index: {}]   ;;  %s4232_s4 = inlined_call_operand.vmem [shape: f32[2,8,384], index: 4, kind: output, shape index: {}]  }
   0x1   :  { %s2747_s17 = smov 0   ;;  %s2749_s18 = smov 0  }
   0x2   :  { %s2751_s19 = smov 0  }
   0x3 LB: > { %s23_s20 = sadd.s32 1, %s2607_s17  ;;  %s26_s21 = sadd.s32 1, %s2611_s18  ;;  %s2615_s19 = sphi %s2751_s19, %s14_s19   ;;  %s2611_s18 = sphi %s2749_s18, %s4366_s18   ;;  %s2607_s17 = sphi %s2747_s17, %s4365_s17   ;;  %s2603_s16 = sphi %s2745_s16, %s4364_s16   ;;  %s2599_s15 = sphi %s2743_s15, %s4363_s15  }
   0x4   : > { %p24_p0 = scmp.ge.s32.totalorder %s23_s20, 2  ;;  %p2341_p1 = scmp.ge.s32.totalorder %s2615_s19, 1 }
   0x5   : > { %p201_p2 = scmp.lt.s32.totalorder %s2615_s19, 5 }
   0x6   : > { %s4368_s20 = smov (%p24_p0, %s23_s20), 0  ;;  %s4370_s21 = smov (!%p24_p0, %s26_s21), %s2611_s18 }
   0x7   : > { %p202_p3 = pnand %p2341_p1, %p201_p2  ;;  %p28_p4 = scmp.ge.s32.totalorder %s4370_s21, 2 }
   0x9   : > { %s4372_s21 = smov (%p28_p4, %s4370_s21), 0  ;;  %205 = sbr.rel (%p202_p3) target bundleno = 1130 (0x46a), region = 36 }
  0x10   : > { %p239_p5 = scmp.lt.s32.totalorder %s2603_s16, 1  ;;  %p244_p6 = scmp.lt.s32.totalorder %s2599_s15, 1 }
  0x11   : > { %p2347_p7 = scmp.ne.s32.totalorder %s2599_s15, 0 }
  0x12   : > { %s4374_s16 = smov (!%p239_p5, %s2603_s16), 1  ;;  %v2617_v0 = vmov (!%p2347_p7), 0.0  }
  0x13   : > { %s245_s22 = scalar_select %p244_p6, %s2599_s15, 1 }
  0x14   : > { %s2369_s23 = smul.u32 24, %s4374_s16  ;;  %265 = vst [vmem:[#allocation3] sm:$0xff] (!%p2347_p7), %v2617_v0  ;;  %266 = vst [vmem:[#allocation3 + $0x8] sm:$0xff] (!%p2347_p7), %v2617_v0 }
  0x15   : > { %s2777_s24 = sshll.u32 %s245_s22, 3  ;;  %264 = sbr.rel (%p2347_p7) target bundleno = 28 (0x1c), region = 40  ;;  %267 = vst [vmem:[#allocation3 + $0x10] sm:$0xff] (!%p2347_p7), %v2617_v0  ;;  %268 = vst [vmem:[#allocation2] sm:$0xff] (!%p2347_p7), %v2617_v0 }
  0x16   : > { %s243_s27 = scalar_lea.vmem %s4228_s0, %s2369_s23  ;;  %s247_s30 = scalar_lea.vmem %s4229_s1, %s2777_s24  ;;  %269 = vst [vmem:[#allocation2 + $0x20] sm:$0xff] (!%p2347_p7), %v2617_v0 }
  0x17   : > { %s251_s7 = scalar_lea.vmem %s4230_s2, %s2777_s24  ;;  %s255_s10 = scalar_lea.vmem %s4231_s3, %s2777_s24 }
  0x18   : > { %s2797_s13 = scalar_lea.vmem %s4232_s4, %s2369_s23 }
  0x1c PF: > { %v272_v1 = vld [vmem:[%s243_s27 + $0x8] sm:$0xff]  ;;  %v2800_v2 = vld [vmem:[%s251_s7] sm:$0xff]  ;;  %v2618_v3 = vmov 2   ;;  %v2619_v4 = vmov 0   ;;  %v2620_v6 = vmov 0.0   ;;  %v273_v7 = vld [vmem:[%s243_s27 + $0x10] sm:$0xff] }
  0x1d   : > { %2513 = vset.pattern.permute.xlu1 %v2618_v3  ;;  %2511 = vset.pattern.permute.xlu0 %v2619_v4  ;;  %v271_v5 = vld [vmem:[%s243_s27] sm:$0xff]  ;;  %vm274_vm0 = vcmask 64512   ;;  %vm2621_vm1 = vmmov 0   ;;  %v2622_v9 = vmov 1   ;;  %v2623_v10 = vmov 10   ;;  %s2657_s14 = smov 126  }
  0x1e   : > { %278 = vmatprep.subr.mxu0 %v272_v1  ;;  %2359 = vmatprep.subr.mxu1 %v2620_v6  ;;  %v270_v8 = vld [vmem:[%s247_s30] sm:$0xff]  ;;  %v2624_v11 = vmov 3   ;;  %v2625_v12 = vmov 12   ;;  %v2626_v13 = vmov 4   ;;  %v2627_v14 = vmov 13   ;;  %s2658_s16 = smov 127  }
  0x1f   : > { %555 = vperm.xlu1 %2513, %v2800_v2   ;;  %511 = vperm.xlu0 %2511, %v2800_v2   ;;  %v2628_v15 = vmov 5   ;;  %v2629_v16 = vmov 15   ;;  %v2630_v17 = vmov 6   ;;  %v2631_v18 = vmov 16   ;;  %v2839_v44 = vld [vmem:[#allocation2] sm:$0xff]  ;;  %s2669_s22 = smov 125  }
  0x20   : > { %279 = vmatpush1.msra.mxu0 %v271_v5  ;;  %342 = vmatprep.mubr.f32.mxu0 %v2620_v6  ;;  %v2632_v19 = vmov 7   ;;  %v2633_v20 = vmov 18   ;;  %v2634_v21 = vmov 8   ;;  %v2635_v22 = vmov 19   ;;  %s2670_s23 = smov 124   ;;  %s2672_s25 = smov 123  }
  0x21   : > { %2360 = vmatpush3.msra.mxu1 %v273_v7  ;;  %2361 = vmatprep.mubr.msk.f32.mxu1 %vm2621_vm1, %v2620_v6  ;;  %v2636_v23 = vmov 9   ;;  %v2637_v24 = vmov 21   ;;  %v2638_v25 = vmov 11   ;;  %v2639_v26 = vmov 22   ;;  %s2674_s26 = smov 122   ;;  %s2675_s27 = smov 109  }
  0x22   : > { %2348 = vmatmul.mubr.msk.f32.vlgmr.msra.gmra.mrb[0].mxu0 %vm274_vm0, %v270_v8  ;;  %2362 = vmatmul.mubr.msk.f32.vlgmr.msra.gmra.mrb[0].mxu1 %vm274_vm0, %v270_v8  ;;  %v2640_v27 = vmov 24   ;;  %v2641_v28 = vmov 14   ;;  %v2642_v29 = vmov 25   ;;  %v2643_v30 = vmov 17   ;;  %s2676_s28 = smov 108   ;;  %s2677_s29 = smov 107  }
  0x23   : > { %2512 = vset.pattern.permute.xlu0 %v2622_v9  ;;  %2521 = vset.pattern.permute.xlu1 %v2623_v10  ;;  %v2644_v31 = vmov 27   ;;  %v2645_v32 = vmov 20   ;;  %v2646_v33 = vmov 28   ;;  %v2647_v34 = vmov 23   ;;  %s2678_s30 = smov 106   ;;  %s2679_s5 = smov 105  }
  0x24   : > { %523 = vperm.xlu0 %2512, %v2800_v2   ;;  %811 = vperm.xlu1 %2521, %v2800_v2   ;;  %v2648_v35 = vmov 30   ;;  %v2649_v36 = vmov 26   ;;  %v2650_v37 = vmov 31   ;;  %v2651_v38 = vmov 29   ;;  %s2680_s6 = smov 104   ;;  %s2681_s7 = smov 103  }
  0x25   : > { %2364 = vmatprep.subr.mxu1 %v2620_v6  ;;  %2142 = vmatprep.mubr.f32.mxu0 %v2620_v6  ;;  %v2652_v39 = vmov 33   ;;  %v2653_v40 = vmov 32   ;;  %v2654_v41 = vmov 34   ;;  %v2655_v42 = vmov 35   ;;  %s2682_s8 = smov 90   ;;  %s2683_s9 = smov 89  }
  0x26   : > { %2366 = vmatprep.mubr.msk.f32.mxu1 %vm2621_vm1, %v2620_v6  ;;  %v2656_v43 = vmov 36   ;;  %v2659_v50 = vmov 38   ;;  %v2660_v51 = vmov 41   ;;  %v2661_v52 = vmov 37   ;;  %s2684_s11 = smov 88   ;;  %s2685_s12 = smov 87  }
  0x27   : > { %v2662_v54 = vmov 43   ;;  %v2663_v55 = vmov 39   ;;  %v2664_v57 = vmov 44   ;;  %v2665_v58 = vmov 40   ;;  %p2352_p8 = scmp.ne.s32.totalorder %s2599_s15, 1 }
  0x28   : > { %2514 = vset.pattern.permute.xlu0 %v2624_v11  ;;  %2523 = vset.pattern.permute.xlu1 %v2625_v12  ;;  %v2666_v60 = vmov 45   ;;  %v2667_v61 = vmov 42   ;;  %v2668_v1 = vmov 46   ;;  %v2671_v6 = vmov 47  }
  0x29   : > { %587 = vperm.xlu0 %2514, %v2800_v2   ;;  %875 = vperm.xlu1 %2523, %v2800_v2   ;;  %v2673_v9 = vmov 48   ;;  %vm542_vm5 = vcmask 1039360   ;;  %vm574_vm6 = vcmask 1031168   ;;  %vm606_vm7 = vcmask 1022976  }
  0x2a   : > { %vm638_vm8 = vcmask 1014784   ;;  %vm670_vm9 = vcmask 1006592   ;;  %vm702_vm10 = vcmask 998400   ;;  %vm734_vm11 = vcmask 891904  }
  0x2b   : > { %vm766_vm12 = vcmask 883712   ;;  %vm798_vm13 = vcmask 875520   ;;  %vm830_vm14 = vcmask 867328   ;;  %vm862_vm15 = vcmask 859136  }
  0x2c   : > { %vm894_vm1 = vcmask 850944  }
  0x2d   : > { %2515 = vset.pattern.permute.xlu0 %v2626_v13  ;;  %2524 = vset.pattern.permute.xlu1 %v2627_v14 }
  0x2e   : > { %619 = vperm.xlu0 %2515, %v2800_v2   ;;  %907 = vperm.xlu1 %2524, %v2800_v2  }
  0x32   : > { %2516 = vset.pattern.permute.xlu0 %v2628_v15  ;;  %2526 = vset.pattern.permute.xlu1 %v2629_v16 }
  0x33   : > { %651 = vperm.xlu0 %2516, %v2800_v2   ;;  %971 = vperm.xlu1 %2526, %v2800_v2  }
  0x37   : > { %2517 = vset.pattern.permute.xlu0 %v2630_v17  ;;  %2527 = vset.pattern.permute.xlu1 %v2631_v18 }
  0x38   : > { %683 = vperm.xlu0 %2517, %v2800_v2   ;;  %1003 = vperm.xlu1 %2527, %v2800_v2  }
  0x3c   : > { %2518 = vset.pattern.permute.xlu0 %v2632_v19  ;;  %2529 = vset.pattern.permute.xlu1 %v2633_v20 }
  0x3d   : > { %715 = vperm.xlu0 %2518, %v2800_v2   ;;  %1067 = vperm.xlu1 %2529, %v2800_v2  }
  0x41   : > { %2519 = vset.pattern.permute.xlu0 %v2634_v21  ;;  %2530 = vset.pattern.permute.xlu1 %v2635_v22 }
  0x42   : > { %747 = vperm.xlu0 %2519, %v2800_v2   ;;  %1099 = vperm.xlu1 %2530, %v2800_v2  }
  0x46   : > { %2520 = vset.pattern.permute.xlu0 %v2636_v23  ;;  %2532 = vset.pattern.permute.xlu1 %v2637_v24 }
  0x47   : > { %779 = vperm.xlu0 %2520, %v2800_v2   ;;  %1163 = vperm.xlu1 %2532, %v2800_v2  }
  0x4b   : > { %2522 = vset.pattern.permute.xlu0 %v2638_v25  ;;  %2533 = vset.pattern.permute.xlu1 %v2639_v26 }
  0x4c   : > { %843 = vperm.xlu0 %2522, %v2800_v2   ;;  %1195 = vperm.xlu1 %2533, %v2800_v2  }
  0x50   : > { %2535 = vset.pattern.permute.xlu1 %v2640_v27  ;;  %2525 = vset.pattern.permute.xlu0 %v2641_v28 }
  0x51   : > { %1259 = vperm.xlu1 %2535, %v2800_v2   ;;  %939 = vperm.xlu0 %2525, %v2800_v2  }
  0x55   : > { %2536 = vset.pattern.permute.xlu1 %v2642_v29  ;;  %2528 = vset.pattern.permute.xlu0 %v2643_v30 }
  0x56   : > { %1286 = vperm.xlu1 %2536, %v2800_v2   ;;  %1035 = vperm.xlu0 %2528, %v2800_v2  }
  0x5a   : > { %2538 = vset.pattern.permute.xlu1 %v2644_v31  ;;  %2531 = vset.pattern.permute.xlu0 %v2645_v32 }
  0x5b   : > { %1350 = vperm.xlu1 %2538, %v2800_v2   ;;  %1131 = vperm.xlu0 %2531, %v2800_v2  }
  0x5f   : > { %2539 = vset.pattern.permute.xlu1 %v2646_v33  ;;  %2534 = vset.pattern.permute.xlu0 %v2647_v34 }
  0x60   : > { %1382 = vperm.xlu1 %2539, %v2800_v2   ;;  %1227 = vperm.xlu0 %2534, %v2800_v2  }
  0x64   : > { %2541 = vset.pattern.permute.xlu1 %v2648_v35  ;;  %2537 = vset.pattern.permute.xlu0 %v2649_v36 }
  0x65   : > { %1446 = vperm.xlu1 %2541, %v2800_v2   ;;  %1318 = vperm.xlu0 %2537, %v2800_v2  }
  0x69   : > { %2542 = vset.pattern.permute.xlu1 %v2650_v37  ;;  %2540 = vset.pattern.permute.xlu0 %v2651_v38 }
  0x6a   : > { %1478 = vperm.xlu1 %2542, %v2800_v2   ;;  %1414 = vperm.xlu0 %2540, %v2800_v2  }
  0x6e   : > { %2544 = vset.pattern.permute.xlu1 %v2652_v39  ;;  %2543 = vset.pattern.permute.xlu0 %v2653_v40 }
  0x6f   : > { %1542 = vperm.xlu1 %2544, %v2800_v2   ;;  %1510 = vperm.xlu0 %2543, %v2800_v2  }
  0x73   : > { %2545 = vset.pattern.permute.xlu1 %v2654_v41  ;;  %2546 = vset.pattern.permute.xlu0 %v2655_v42 }
  0x74   : > { %1574 = vperm.xlu1 %2545, %v2800_v2  }
  0x78   : > { %2547 = vset.pattern.permute.xlu1 %v2656_v43 }
  0x9e   : > { %v2841_v45 = vpop.permute.xlu1 %555  ;;  %v2843_v46 = vpop.permute.xlu0 %511 }
  0x9f   : > { %v558_v47 = vmul.f32 %v2841_v45, %v2839_v44 }
  0xa1   : > { %566 = vrot.lane.b32.xlu0 %v558_v47, %s2657_s14 }
  0xa3   : > { %v2848_v48 = vpop.permute.xlu0 %523  ;;  %v2872_v63 = vpop.permute.xlu1 %811 }
  0xa4   : > { %v526_v49 = vmul.f32 %v2848_v48, %v2839_v44  ;;  %v814_v17 = vmul.f32 %v2872_v63, %v2839_v44 }
  0xa5   : > { %1606 = vperm.xlu0 %2546, %v2800_v2  }
  0xa6   : > { %534 = vrot.lane.b32.xlu1 %v526_v49, %s2658_s16 }
  0xa8   : > { %v2858_v53 = vpop.permute.xlu0 %587  ;;  %v2883_v5 = vpop.permute.xlu1 %875 }
  0xa9   : > { %2549 = vset.pattern.permute.xlu0 %v2659_v50  ;;  %v590_v62 = vmul.f32 %v2858_v53, %v2839_v44  ;;  %v878_v21 = vmul.f32 %v2883_v5, %v2839_v44 }
  0xaa   : > { %1702 = vperm.xlu0 %2549, %v2800_v2   ;;  %1638 = vperm.xlu1 %2547, %v2800_v2  }
  0xad   : > { %v2862_v56 = vpop.permute.xlu0 %619  ;;  %v2891_v10 = vpop.permute.xlu1 %907 }
  0xae   : > { %2552 = vset.pattern.permute.xlu0 %v2660_v51  ;;  %2548 = vset.pattern.permute.xlu1 %v2661_v52  ;;  %v622_v3 = vmul.f32 %v2862_v56, %v2839_v44  ;;  %v910_v23 = vmul.f32 %v2891_v10, %v2839_v44 }
  0xaf   : > { %1798 = vperm.xlu0 %2552, %v2800_v2   ;;  %1670 = vperm.xlu1 %2548, %v2800_v2  }
  0xb2   : > { %v2866_v59 = vpop.permute.xlu0 %651  ;;  %v2900_v13 = vpop.permute.xlu1 %971 }
  0xb3   : > { %2554 = vset.pattern.permute.xlu0 %v2662_v54  ;;  %2550 = vset.pattern.permute.xlu1 %v2663_v55  ;;  %v654_v4 = vmul.f32 %v2866_v59, %v2839_v44  ;;  %v974_v27 = vmul.f32 %v2900_v13, %v2839_v44 }
  0xb4   : > { %1862 = vperm.xlu0 %2554, %v2800_v2   ;;  %1734 = vperm.xlu1 %2550, %v2800_v2  }
  0xb7   : > { %v2874_v0 = vpop.permute.xlu0 %683  ;;  %v2909_v16 = vpop.permute.xlu1 %1003 }
  0xb8   : > { %2555 = vset.pattern.permute.xlu0 %v2664_v57  ;;  %2551 = vset.pattern.permute.xlu1 %v2665_v58  ;;  %v686_v8 = vmul.f32 %v2874_v0, %v2839_v44  ;;  %v1006_v29 = vmul.f32 %v2909_v16, %v2839_v44 }
  0xb9   : > { %1894 = vperm.xlu0 %2555, %v2800_v2   ;;  %1766 = vperm.xlu1 %2551, %v2800_v2  }
  0xbc   : > { %v2885_v7 = vpop.permute.xlu0 %715  ;;  %v2916_v19 = vpop.permute.xlu1 %1067 }
  0xbd   : > { %2556 = vset.pattern.permute.xlu0 %v2666_v60  ;;  %2553 = vset.pattern.permute.xlu1 %v2667_v61  ;;  %v718_v12 = vmul.f32 %v2885_v7, %v2839_v44 }
  0xbe   : > { %1926 = vperm.xlu0 %2556, %v2800_v2   ;;  %1830 = vperm.xlu1 %2553, %v2800_v2  }
  0xc1   : > { %v2894_v11 = vpop.permute.xlu0 %747  ;;  %v2924_v22 = vpop.permute.xlu1 %1099 }
  0xc2   : > { %2557 = vset.pattern.permute.xlu0 %v2668_v1  ;;  %598 = vrot.lane.b32.xlu1 %v590_v62, %s2669_s22  ;;  %v750_v14 = vmul.f32 %v2894_v11, %v2839_v44 }
  0xc3   : > { %1958 = vperm.xlu0 %2557, %v2800_v2  }
  0xc6   : > { %630 = vrot.lane.b32.xlu1 %v622_v3, %s2670_s23  ;;  %v2904_v15 = vpop.permute.xlu0 %779  ;;  %v2931_v25 = vpop.permute.xlu1 %1163 }
  0xc7   : > { %2558 = vset.pattern.permute.xlu0 %v2671_v6 }
  0xc8   : > { %1990 = vperm.xlu0 %2558, %v2800_v2  }
  0xca   : > { %662 = vrot.lane.b32.xlu1 %v654_v4, %s2672_s25 }
  0xcb   : > { %v2914_v18 = vpop.permute.xlu0 %843  ;;  %v2939_v28 = vpop.permute.xlu1 %1195 }
  0xcc   : > { %2559 = vset.pattern.permute.xlu0 %v2673_v9  ;;  %v846_v20 = vmul.f32 %v2914_v18, %v2839_v44 }
  0xcd   : > { %2022 = vperm.xlu0 %2559, %v2800_v2   ;;  %v782_v2 = vmul.f32 %v2904_v15, %v2839_v44 }
  0xce   : > { %694 = vrot.lane.b32.xlu1 %v686_v8, %s2674_s26 }
  0xd0   : > { %v2929_v24 = vpop.permute.xlu0 %939  ;;  %v2954_v34 = vpop.permute.xlu1 %1259 }
  0xd1   : > { %v942_v26 = vmul.f32 %v2929_v24, %v2839_v44 }
  0xd2   : > { %726 = vrot.lane.b32.xlu1 %v718_v12, %s2675_s27 }
  0xd5   : > { %v2965_v49 = vpop.permute.xlu1 %1286 }
  0xd6   : > { %758 = vrot.lane.b32.xlu1 %v750_v14, %s2676_s28 }
  0xda   : > { %790 = vrot.lane.b32.xlu1 %v782_v2, %s2677_s29  ;;  %v2967_v52 = vpop.permute.xlu1 %1350 }
  0xde   : > { %822 = vrot.lane.b32.xlu1 %v814_v17, %s2678_s30 }
  0xdf   : > { %v2969_v61 = vpop.permute.xlu1 %1382 }
  0xe2   : > { %854 = vrot.lane.b32.xlu1 %v846_v20, %s2679_s5 }
  0xe6   : > { %886 = vrot.lane.b32.xlu1 %v878_v21, %s2680_s6 }
  0xea   : > { %918 = vrot.lane.b32.xlu1 %v910_v23, %s2681_s7  ;;  %v2971_v23 = vpop.permute.xlu1 %1446 }
  0xee   : > { %950 = vrot.lane.b32.xlu1 %v942_v26, %s2682_s8 }
  0xf2   : > { %982 = vrot.lane.b32.xlu1 %v974_v27, %s2683_s9 }
  0xf5   : > { %v2944_v30 = vpop.f32.mrb[0].mxu0  ;;  %v2946_v31 = vpop.f32.mrb[0].mxu1 }
  0xf6   : > { %v2949_v32 = vmul.f32 0.70710677, %v2944_v30  ;;  %v2952_v33 = vmul.f32 0.70710677, %v2946_v31  ;;  %1014 = vrot.lane.b32.xlu1 %v1006_v29, %s2684_s11  ;;  %v2957_v35 = vpop.f32.mrb[1].mxu0  ;;  %v2363_v36 = vpop.f32.mrb[1].mxu1 }
  0xf7   : > { %v2962_v39 = vmul.f32 0.70710677, %v2957_v35 }
  0xf8   : > { %v422_v37 = vand.u32 2147483647, %v2949_v32  ;;  %v424_v38 = vand.u32 2147483647, %v2952_v33  ;;  %vm482_vm2 = vcmp.ge.f32.partialorder %v2949_v32, 0.0  ;;  %vm484_vm3 = vcmp.ge.f32.partialorder %v2952_v33, 0.0 }
  0xf9   : > { %v423_v42 = vand.u32 2147483647, %v2962_v39  ;;  %vm483_vm4 = vcmp.ge.f32.partialorder %v2962_v39, 0.0  ;;  %v492_v33 = vmul.f32 0.5, %v2957_v35 }
  0xfa   : > { %v425_v40 = vmul.f32 0.3275911, %v422_v37  ;;  %v427_v41 = vmul.f32 0.3275911, %v424_v38  ;;  %v464_v54 = vsub.f32 0.0, %v422_v37  ;;  %v466_v55 = vsub.f32 0.0, %v424_v38 }
  0xfb   : > { %v426_v50 = vmul.f32 0.3275911, %v423_v42  ;;  %v465_v60 = vsub.f32 0.0, %v423_v42 }
  0xfc   : > { %v428_v43 = vadd.f32 1.0, %v425_v40  ;;  %v430_v47 = vadd.f32 1.0, %v427_v41  ;;  %v467_v58 = vmul.f32 %v464_v54, %v422_v37  ;;  %v469_v3 = vmul.f32 %v466_v55, %v424_v38 }
  0xfd   : > { %v429_v51 = vadd.f32 1.0, %v426_v50  ;;  %v468_v14 = vmul.f32 %v465_v60, %v423_v42  ;;  %v2973_v42 = vpop.permute.xlu1 %1478 }
  0xfe   : > { %2560 = vrcp.f32 %v428_v43  ;;  %v470_v9 = vmul.f32 1.442695, %v467_v58  ;;  %v474_v17 = vmul.f32 1.442695, %v469_v3 }
  0xff   : > { %2562 = vrcp.f32 %v430_v47  ;;  %v472_v36 = vmul.f32 1.442695, %v468_v14 }
 0x100   : > { %2564 = vrcp.f32 %v429_v51 }
 0x101   : > { %2566 = vpow2.f32 %v470_v9  ;;  %v2975_v9 = vpop.permute.xlu1 %1542 }
 0x102   : > { %2568 = vpow2.f32 %v474_v17 }
 0x103   : > { %2570 = vpow2.f32 %v472_v36 }
 0x108   : > { %v2561_v57 = vpop.eup %2560 }
 0x109   : > { %v2563_v62 = vpop.eup %2562  ;;  %v437_v1 = vmul.f32 1.0614054, %v2561_v57 }
 0x10a   : > { %v439_v4 = vmul.f32 1.0614054, %v2563_v62  ;;  %v2565_v8 = vpop.eup %2564 }
 0x10b   : > { %v440_v6 = vadd.f32 -1.4531521, %v437_v1  ;;  %v438_v20 = vmul.f32 1.0614054, %v2565_v8 }
 0x10c   : > { %v442_v12 = vadd.f32 -1.4531521, %v439_v4  ;;  %v2567_v4 = vpop.eup %2566 }
 0x10d   : > { %v443_v2 = vmul.f32 %v2561_v57, %v440_v6  ;;  %v441_v27 = vadd.f32 -1.4531521, %v438_v20 }
 0x10e   : > { %v445_v21 = vmul.f32 %v2563_v62, %v442_v12  ;;  %v2569_v12 = vpop.eup %2568 }
 0x10f   : > { %v446_v26 = vadd.f32 1.4214138, %v443_v2  ;;  %v444_v38 = vmul.f32 %v2565_v8, %v441_v27 }
 0x110   : > { %v448_v29 = vadd.f32 1.4214138, %v445_v21 }
 0x111   : > { %v449_v37 = vmul.f32 %v2561_v57, %v446_v26  ;;  %v447_v43 = vadd.f32 1.4214138, %v444_v38  ;;  %v2571_v26 = vpop.eup %2570  ;;  %v2978_v38 = vpop.permute.xlu1 %1574 }
 0x112   : > { %v451_v40 = vmul.f32 %v2563_v62, %v448_v29 }
 0x113   : > { %v452_v41 = vadd.f32 -0.28449672, %v449_v37  ;;  %v450_v51 = vmul.f32 %v2565_v8, %v447_v43 }
 0x114   : > { %v454_v47 = vadd.f32 -0.28449672, %v451_v40  ;;  %v491_v40 = vmul.f32 0.5, %v2944_v30 }
 0x115   : > { %v455_v50 = vmul.f32 %v2561_v57, %v452_v41  ;;  %v453_v58 = vadd.f32 -0.28449672, %v450_v51 }
 0x116   : > { %v457_v54 = vmul.f32 %v2563_v62, %v454_v47  ;;  %v493_v47 = vmul.f32 0.5, %v2946_v31 }
 0x117   : > { %v458_v55 = vadd.f32 0.2548296, %v455_v50  ;;  %v456_v3 = vmul.f32 %v2565_v8, %v453_v58 }
 0x118   : > { %v460_v60 = vadd.f32 0.2548296, %v457_v54  ;;  %v2990_v58 = vpop.permute.xlu1 %534 }
 0x119   : > { %v461_v1 = vmul.f32 %v2561_v57, %v458_v55  ;;  %v459_v2 = vadd.f32 0.2548296, %v456_v3 }
 0x11a   : > { %v463_v6 = vmul.f32 %v2563_v62, %v460_v60 }
 0x11b   : > { %v476_v14 = vmul.f32 %v2567_v4, %v461_v1  ;;  %v462_v21 = vmul.f32 %v2565_v8, %v459_v2 }
 0x11c   : > { %v478_v17 = vmul.f32 %v2569_v12, %v463_v6 }
 0x11d   : > { %v479_v20 = vsub.f32 1.0, %v476_v14  ;;  %v477_v36 = vmul.f32 %v2571_v26, %v462_v21 }
 0x11e   : > { %v481_v27 = vsub.f32 1.0, %v478_v17 }
 0x11f   : > { %v485_v29 = vsub.f32 0.0, %v479_v20  ;;  %v480_v62 = vsub.f32 1.0, %v477_v36 }
 0x120   : > { %v487_v37 = vsub.f32 0.0, %v481_v27 }
 0x121   : > { %v488_v57 = vsel %vm482_vm2, %v479_v20, %v485_v29  ;;  %v486_v50 = vsub.f32 0.0, %v480_v62  ;;  %vm926_vm2 = vcmask 842752  }
 0x122   : > { %v494_v41 = vadd.f32 1.0, %v488_v57  ;;  %v490_v43 = vsel %vm484_vm3, %v481_v27, %v487_v37  ;;  %v3037_v27 = vpop.permute.xlu0 %1035  ;;  %vm958_vm3 = vcmask 736256  }
 0x123   : > { %v496_v8 = vadd.f32 1.0, %v490_v43  ;;  %v489_v54 = vsel %vm483_vm4, %v480_v62, %v486_v50  ;;  %vm990_vm4 = vcmask 728064  }
 0x124   : > { %v2983_v51 = vmul.f32 %v494_v41, %v491_v40  ;;  %v495_v55 = vadd.f32 1.0, %v489_v54 }
 0x125   : > { %v2986_v32 = vmul.f32 %v496_v8, %v493_v47 }
 0x126   : > { %500 = vst [vmem:[#allocation2 + $0x8] sm:$0xff] %v2983_v51  ;;  %v527_v30 = vmul.f32 %v2848_v48, %v2983_v51  ;;  %v2997_v60 = vmul.f32 %v495_v55, %v492_v33  ;;  %v559_v35 = vmul.f32 %v2841_v45, %v2983_v51  ;;  %v591_v12 = vmul.f32 %v2858_v53, %v2983_v51  ;;  %v3050_v62 = vpop.permute.xlu0 %1131 }
 0x127   : > { %502 = vst [vmem:[#allocation2 + $0x18] sm:$0xff] %v2986_v32  ;;  %v529_v31 = vmul.f32 %v2848_v48, %v2986_v32  ;;  %v817_v39 = vmul.f32 %v2872_v63, %v2986_v32  ;;  %v561_v3 = vmul.f32 %v2841_v45, %v2986_v32  ;;  %v849_v4 = vmul.f32 %v2914_v18, %v2986_v32 }
 0x128   : > { %536 = vrot.lane.b32.xlu1 %v527_v30, %s2658_s16  ;;  %501 = vst [vmem:[#allocation2 + $0x10] sm:$0xff] %v2997_v60  ;;  %v881_v14 = vmul.f32 %v2883_v5, %v2986_v32  ;;  %v593_v2 = vmul.f32 %v2858_v53, %v2986_v32  ;;  %v913_v17 = vmul.f32 %v2891_v10, %v2986_v32 }
 0x129   : > { %540 = vrot.lane.b32.xlu0 %v529_v31, %s2658_s16  ;;  %v3006_v1 = vpop.permute.xlu1 %1638  ;;  %v623_v21 = vmul.f32 %v2862_v56, %v2983_v51  ;;  %v945_v26 = vmul.f32 %v2929_v24, %v2986_v32  ;;  %v625_v36 = vmul.f32 %v2862_v56, %v2986_v32  ;;  %v977_v37 = vmul.f32 %v2900_v13, %v2986_v32 }
 0x12a   : > { %4270 = vst [vmem:[#allocation4_spill] sm:$0xff] %v3006_v1  ;;  %v655_v57 = vmul.f32 %v2866_v59, %v2983_v51  ;;  %v1007_v40 = vmul.f32 %v2909_v16, %v2983_v51  ;;  %v657_v43 = vmul.f32 %v2866_v59, %v2986_v32  ;;  %v1009_v47 = vmul.f32 %v2909_v16, %v2986_v32  ;;  %v3065_v50 = vpop.permute.xlu0 %1227 }
 0x12b   : > { %v687_v54 = vmul.f32 %v2874_v0, %v2983_v51  ;;  %v560_v33 = vmul.f32 %v2841_v45, %v2997_v60  ;;  %v689_v30 = vmul.f32 %v2874_v0, %v2986_v32  ;;  %v719_v45 = vmul.f32 %v2885_v7, %v2983_v51 }
 0x12c   : > { %568 = vrot.lane.b32.xlu1 %v559_v35, %s2657_s14  ;;  %v592_v35 = vmul.f32 %v2858_v53, %v2997_v60  ;;  %v721_v53 = vmul.f32 %v2885_v7, %v2986_v32 }
 0x12d   : > { %828 = vrot.lane.b32.xlu0 %v817_v39, %s2678_s30  ;;  %v624_v39 = vmul.f32 %v2862_v56, %v2997_v60  ;;  %v751_v56 = vmul.f32 %v2894_v11, %v2983_v51 }
 0x12e   : > { %v3016_v6 = vpop.permute.xlu1 %1670  ;;  %v3078_v31 = vpop.permute.xlu0 %1318 }
 0x130   : > { %572 = vrot.lane.b32.xlu1 %v561_v3, %s2657_s14 }
 0x131   : > { %860 = vrot.lane.b32.xlu0 %v849_v4, %s2679_s5 }
 0x132   : > { %v3091_v4 = vpop.permute.xlu0 %1414 }
 0x133   : > { %v3028_v20 = vpop.permute.xlu1 %1734 }
 0x134   : > { %600 = vrot.lane.b32.xlu1 %v591_v12, %s2669_s22  ;;  %v656_v12 = vmul.f32 %v2866_v59, %v2997_v60  ;;  %v753_v59 = vmul.f32 %v2894_v11, %v2986_v32 }
 0x135   : > { %892 = vrot.lane.b32.xlu0 %v881_v14, %s2680_s6 }
 0x138   : > { %604 = vrot.lane.b32.xlu1 %v593_v2, %s2669_s22  ;;  %v3040_v29 = vpop.permute.xlu1 %1766  ;;  %v3104_v2 = vpop.permute.xlu0 %1510 }
 0x139   : > { %924 = vrot.lane.b32.xlu0 %v913_v17, %s2681_s7  ;;  %v688_v17 = vmul.f32 %v2874_v0, %v2997_v60  ;;  %v783_v0 = vmul.f32 %v2904_v15, %v2983_v51 }
 0x13c   : > { %632 = vrot.lane.b32.xlu1 %v623_v21, %s2670_s23  ;;  %v720_v21 = vmul.f32 %v2885_v7, %v2997_v60  ;;  %v785_v7 = vmul.f32 %v2904_v15, %v2986_v32 }
 0x13d   : > { %956 = vrot.lane.b32.xlu0 %v945_v26, %s2682_s8  ;;  %v3054_v41 = vpop.permute.xlu1 %1830 }
 0x13e   : > { %4271 = vst [vmem:[#allocation5_spill] sm:$0xff] %v3054_v41  ;;  %v1482_v41 = vmul.f32 %v2973_v42, %v2997_v60 }
 0x140   : > { %636 = vrot.lane.b32.xlu1 %v625_v36, %s2670_s23  ;;  %v3117_v36 = vpop.permute.xlu0 %566 }
 0x141   : > { %988 = vrot.lane.b32.xlu0 %v977_v37, %s2683_s9  ;;  %v3062_v8 = vpop.permute.xlu1 %598  ;;  %v752_v37 = vmul.f32 %v2894_v11, %v2997_v60  ;;  %v815_v11 = vmul.f32 %v2872_v63, %v2983_v51 }
 0x144   : > { %664 = vrot.lane.b32.xlu1 %v655_v57, %s2672_s25 }
 0x145   : > { %1016 = vrot.lane.b32.xlu0 %v1007_v40, %s2684_s11  ;;  %v3074_v55 = vpop.permute.xlu1 %630  ;;  %v3130_v40 = vpop.permute.xlu0 %1606 }
 0x148   : > { %668 = vrot.lane.b32.xlu1 %v657_v43, %s2672_s25  ;;  %v784_v43 = vmul.f32 %v2904_v15, %v2997_v60  ;;  %v847_v15 = vmul.f32 %v2914_v18, %v2983_v51 }
 0x149   : > { %1020 = vrot.lane.b32.xlu0 %v1009_v47, %s2684_s11  ;;  %v3088_v3 = vpop.permute.xlu1 %662  ;;  %v1039_v47 = vmul.f32 %v3037_v27, %v2983_v51 }
 0x14c   : > { %696 = vrot.lane.b32.xlu1 %v687_v54, %s2674_s26 }
 0x14d   : > { %570 = vrot.lane.b32.xlu0 %v560_v33, %s2657_s14  ;;  %v3100_v14 = vpop.permute.xlu1 %694  ;;  %v3143_v33 = vpop.permute.xlu0 %1702  ;;  %s2686_s14 = smov 86  }
 0x14e   : > { %4272 = vst [vmem:[#allocation6_spill] sm:$0xff] %v3100_v14  ;;  %v515_v14 = vmul.f32 %v2843_v46, %v2983_v51 }
 0x150   : > { %700 = vrot.lane.b32.xlu1 %v689_v30, %s2674_s26  ;;  %v1041_v30 = vmul.f32 %v3037_v27, %v2986_v32 }
 0x151   : > { %602 = vrot.lane.b32.xlu0 %v592_v35, %s2669_s22  ;;  %v3114_v26 = vpop.permute.xlu1 %726  ;;  %s2687_s22 = smov 85  }
 0x152   : > { %4273 = vst [vmem:[#allocation7_spill] sm:$0xff] %v3114_v26 }
 0x154   : > { %728 = vrot.lane.b32.xlu1 %v719_v45, %s2675_s27  ;;  %v879_v45 = vmul.f32 %v2883_v5, %v2983_v51 }
 0x155   : > { %634 = vrot.lane.b32.xlu0 %v624_v39, %s2670_s23  ;;  %v3126_v57 = vpop.permute.xlu1 %758  ;;  %v3156_v39 = vpop.permute.xlu0 %1798  ;;  %s2688_s23 = smov 84  }
 0x156   : > { %4274 = vst [vmem:[#allocation8_spill] sm:$0xff] %v3126_v57 }
 0x158   : > { %732 = vrot.lane.b32.xlu1 %v721_v53, %s2675_s27  ;;  %v1071_v53 = vmul.f32 %v2916_v19, %v2983_v51 }
 0x159   : > { %666 = vrot.lane.b32.xlu0 %v656_v12, %s2672_s25  ;;  %v3140_v54 = vpop.permute.xlu1 %790  ;;  %v911_v12 = vmul.f32 %v2891_v10, %v2983_v51  ;;  %s2690_s25 = smov 70  }
 0x15a   : > { %4275 = vst [vmem:[#allocation9_spill] sm:$0xff] %v3140_v54 }
 0x15c   : > { %760 = vrot.lane.b32.xlu1 %v751_v56, %s2676_s28  ;;  %v1073_v56 = vmul.f32 %v2916_v19, %v2986_v32 }
 0x15d   : > { %698 = vrot.lane.b32.xlu0 %v688_v17, %s2674_s26  ;;  %v3152_v35 = vpop.permute.xlu1 %822  ;;  %s2691_s26 = smov 69  }
 0x15e   : > { %4276 = vst [vmem:[#allocation10_spill] sm:$0xff] %v3152_v35  ;;  %v1418_v35 = vmul.f32 %v3091_v4, %v2997_v60 }
 0x160   : > { %764 = vrot.lane.b32.xlu1 %v753_v59, %s2676_s28  ;;  %v3169_v59 = vpop.permute.xlu0 %1862 }
 0x161   : > { %730 = vrot.lane.b32.xlu0 %v720_v21, %s2675_s27  ;;  %v3166_v17 = vpop.permute.xlu1 %854  ;;  %4278 = vst [vmem:[#allocation12_spill] sm:$0xff] %v3169_v59  ;;  %v943_v21 = vmul.f32 %v2929_v24, %v2983_v51  ;;  %s2692_s27 = smov 68  }
 0x162   : > { %4277 = vst [vmem:[#allocation11_spill] sm:$0xff] %v3166_v17 }
 0x164   : > { %792 = vrot.lane.b32.xlu1 %v783_v0, %s2677_s29  ;;  %v1103_v0 = vmul.f32 %v2924_v22, %v2983_v51 }
 0x165   : > { %762 = vrot.lane.b32.xlu0 %v752_v37, %s2676_s28  ;;  %v3178_v37 = vpop.permute.xlu1 %886  ;;  %s2693_s28 = smov 67  }
 0x166   : > { %4279 = vst [vmem:[#allocation13_spill] sm:$0xff] %v3178_v37  ;;  %v1354_v37 = vmul.f32 %v2967_v52, %v2997_v60 }
 0x168   : > { %796 = vrot.lane.b32.xlu1 %v785_v7, %s2677_s29  ;;  %v975_v7 = vmul.f32 %v2900_v13, %v2983_v51 }
 0x169   : > { %794 = vrot.lane.b32.xlu0 %v784_v43, %s2677_s29  ;;  %v3182_v43 = vpop.permute.xlu0 %1894  ;;  %s2694_s29 = smov 66  }
 0x16a   : > { %4280 = vst [vmem:[#allocation14_spill] sm:$0xff] %v3182_v43  ;;  %v1322_v43 = vmul.f32 %v3078_v31, %v2997_v60 }
 0x16c   : > { %824 = vrot.lane.b32.xlu1 %v815_v11, %s2678_s30  ;;  %v1105_v11 = vmul.f32 %v2924_v22, %v2986_v32 }
 0x16d   : > { %1048 = vrot.lane.b32.xlu0 %v1039_v47, %s2685_s12  ;;  %v528_v47 = vmul.f32 %v2848_v48, %v2997_v60 }
 0x170   : > { %856 = vrot.lane.b32.xlu1 %v847_v15, %s2679_s5  ;;  %v1135_v15 = vmul.f32 %v3050_v62, %v2983_v51 }
 0x171   : > { %1052 = vrot.lane.b32.xlu0 %v1041_v30, %s2685_s12  ;;  %v3192_v30 = vpop.permute.xlu1 %918 }
 0x172   : > { %4281 = vst [vmem:[#allocation15_spill] sm:$0xff] %v3192_v30 }
 0x174   : > { %888 = vrot.lane.b32.xlu1 %v879_v45, %s2680_s6  ;;  %v3195_v45 = vpop.permute.xlu0 %1926 }
 0x175   : > { %1080 = vrot.lane.b32.xlu0 %v1071_v53, %s2686_s14  ;;  %4282 = vst [vmem:[#allocation16_spill] sm:$0xff] %v3195_v45  ;;  %v816_v53 = vmul.f32 %v2872_v63, %v2997_v60  ;;  %v3204_v48 = vpop.permute.xlu1 %950  ;;  %v880_v63 = vmul.f32 %v2883_v5, %v2997_v60 }
 0x176   : > { %4283 = vst [vmem:[#allocation17_spill] sm:$0xff] %v3204_v48 }
 0x178   : > { %920 = vrot.lane.b32.xlu1 %v911_v12, %s2681_s7  ;;  %v1137_v12 = vmul.f32 %v3050_v62, %v2986_v32 }
 0x179   : > { %1084 = vrot.lane.b32.xlu0 %v1073_v56, %s2686_s14  ;;  %v848_v56 = vmul.f32 %v2914_v18, %v2997_v60 }
 0x17c   : > { %952 = vrot.lane.b32.xlu1 %v943_v21, %s2682_s8  ;;  %v3208_v21 = vpop.permute.xlu0 %1958 }
 0x17d   : > { %1112 = vrot.lane.b32.xlu0 %v1103_v0, %s2687_s22  ;;  %4284 = vst [vmem:[#allocation18_spill] sm:$0xff] %v3208_v21  ;;  %v1167_v0 = vmul.f32 %v2931_v25, %v2983_v51 }
 0x180   : > { %984 = vrot.lane.b32.xlu1 %v975_v7, %s2683_s9  ;;  %v1169_v7 = vmul.f32 %v2931_v25, %v2986_v32  ;;  %v3221_v18 = vpop.permute.xlu0 %1990 }
 0x181   : > { %1116 = vrot.lane.b32.xlu0 %v1105_v11, %s2687_s22  ;;  %v3218_v11 = vpop.permute.xlu1 %982  ;;  %4286 = vst [vmem:[#allocation20_spill] sm:$0xff] %v3221_v18 }
 0x182   : > { %4285 = vst [vmem:[#allocation19_spill] sm:$0xff] %v3218_v11  ;;  %v1104_v11 = vmul.f32 %v2924_v22, %v2997_v60 }
 0x184   : > { %538 = vrot.lane.b32.xlu1 %v528_v47, %s2658_s16  ;;  %s2689_s16 = smov 71   ;;  %v912_v47 = vmul.f32 %v2891_v10, %v2997_v60 }
 0x185   : > { %1144 = vrot.lane.b32.xlu0 %v1135_v15, %s2688_s23  ;;  %v1199_v15 = vmul.f32 %v2939_v28, %v2983_v51  ;;  %v3230_v5 = vpop.permute.xlu1 %1014 }
 0x186   : > { %4287 = vst [vmem:[#allocation21_spill] sm:$0xff] %v3230_v5  ;;  %v1290_v5 = vmul.f32 %v2965_v49, %v2997_v60 }
 0x188   : > { %826 = vrot.lane.b32.xlu1 %v816_v53, %s2678_s30  ;;  %v944_v53 = vmul.f32 %v2929_v24, %v2997_v60  ;;  %s2695_s30 = smov 65  }
 0x189   : > { %1148 = vrot.lane.b32.xlu0 %v1137_v12, %s2688_s23  ;;  %v3234_v12 = vpop.permute.xlu0 %2022 }
 0x18a   : > { %4288 = vst [vmem:[#allocation22_spill] sm:$0xff] %v3234_v12 }
 0x18c   : > { %858 = vrot.lane.b32.xlu1 %v848_v56, %s2679_s5  ;;  %v1201_v56 = vmul.f32 %v2939_v28, %v2986_v32  ;;  %s2696_s5 = smov 52  }
 0x18d   : > { %1176 = vrot.lane.b32.xlu0 %v1167_v0, %s2689_s16  ;;  %v976_v0 = vmul.f32 %v2900_v13, %v2997_v60  ;;  %v1233_v13 = vmul.f32 %v3065_v50, %v2986_v32 }
 0x190   : > { %890 = vrot.lane.b32.xlu1 %v880_v63, %s2680_s6  ;;  %s2697_s6 = smov 51  }
 0x191   : > { %1180 = vrot.lane.b32.xlu0 %v1169_v7, %s2689_s16  ;;  %v1231_v7 = vmul.f32 %v3065_v50, %v2983_v51 }
 0x194   : > { %922 = vrot.lane.b32.xlu1 %v912_v47, %s2681_s7  ;;  %v1008_v47 = vmul.f32 %v2909_v16, %v2997_v60  ;;  %s2698_s7 = smov 50  }
 0x195   : > { %1208 = vrot.lane.b32.xlu0 %v1199_v15, %s2690_s25 }
 0x198   : > { %954 = vrot.lane.b32.xlu1 %v944_v53, %s2682_s8  ;;  %s2699_s8 = smov 49  }
 0x199   : > { %1212 = vrot.lane.b32.xlu0 %v1201_v56, %s2690_s25  ;;  %v1040_v56 = vmul.f32 %v3037_v27, %v2997_v60 }
 0x19a   : > { %v3240_v10 = vpop.permute.xlu1 %536 }
 0x19b   : > { %v3244_v63 = vpop.permute.xlu0 %540 }
 0x19c   : > { %986 = vrot.lane.b32.xlu1 %v976_v0, %s2683_s9  ;;  %v1262_v0 = vmul.f32 %v2954_v34, %v2983_v51  ;;  %s2700_s9 = smov 48  }
 0x19d   : > { %1240 = vrot.lane.b32.xlu0 %v1231_v7, %s2691_s26 }
 0x19e   : > { %v3250_v24 = vpop.permute.xlu1 %568 }
 0x19f   : > { %v3254_v15 = vpop.permute.xlu0 %828 }
 0x1a0   : > { %1018 = vrot.lane.b32.xlu1 %v1008_v47, %s2684_s11  ;;  %v1038_v47 = vmul.f32 %v3037_v27, %v2839_v44  ;;  %v3289_v27 = vld [vmem:[#allocation2 + $0x20] sm:$0xff]  ;;  %s2701_s11 = smov 47  }
 0x1a1   : > { %1244 = vrot.lane.b32.xlu0 %v1233_v13, %s2691_s26  ;;  %v1264_v13 = vmul.f32 %v2954_v34, %v2986_v32  ;;  %v1292_v45 = vmul.f32 %v2965_v49, %v3289_v27  ;;  %v1324_v48 = vmul.f32 %v3078_v31, %v3289_v27  ;;  %v1388_v17 = vmul.f32 %v2969_v61, %v3289_v27 }
 0x1a2   : > { %v3260_v53 = vpop.permute.xlu1 %572  ;;  %v1452_v57 = vmul.f32 %v2971_v23, %v3289_v27 }
 0x1a3   : > { %v3266_v7 = vpop.permute.xlu0 %860 }
 0x1a4   : > { %1050 = vrot.lane.b32.xlu1 %v1040_v56, %s2685_s12  ;;  %v1072_v56 = vmul.f32 %v2916_v19, %v2997_v60 }
 0x1a5   : > { %1268 = vrot.lane.b32.xlu0 %v1262_v0, %s2692_s27 }
 0x1a6   : > { %v3270_v16 = vpop.permute.xlu1 %600 }
 0x1a7   : > { %v3276_v12 = vpop.permute.xlu0 %892 }
 0x1a8   : > { %4289 = vst [vmem:[#allocation23_spill] sm:$0xff] %v3276_v12  ;;  %1046 = vrot.lane.b32.xlu1 %v1038_v47, %s2685_s12  ;;  %v1514_v12 = vmul.f32 %v3104_v2, %v2997_v60  ;;  %s2702_s12 = smov 46  }
 0x1a9   : > { %1272 = vrot.lane.b32.xlu0 %v1264_v13, %s2692_s27  ;;  %v1070_v13 = vmul.f32 %v2916_v19, %v2839_v44 }
 0x1aa   : > { %v3280_v18 = vpop.permute.xlu1 %604 }
 0x1ab   : > { %v3284_v0 = vpop.permute.xlu0 %924 }
 0x1ac   : > { %4290 = vst [vmem:[#allocation24_spill] sm:$0xff] %v3284_v0  ;;  %1082 = vrot.lane.b32.xlu1 %v1072_v56, %s2686_s14  ;;  %v1450_v0 = vmul.f32 %v2971_v23, %v2997_v60 }
 0x1ad   : > { %1299 = vrot.lane.b32.xlu0 %v1290_v5, %s2693_s28 }
 0x1ae   : > { %v3292_v47 = vpop.permute.xlu1 %632 }
 0x1af   : > { %v3296_v21 = vpop.permute.xlu0 %956 }
 0x1b0   : > { %4291 = vst [vmem:[#allocation25_spill] sm:$0xff] %v3296_v21  ;;  %1078 = vrot.lane.b32.xlu1 %v1070_v13, %s2686_s14  ;;  %v1420_v21 = vmul.f32 %v3091_v4, %v3289_v27  ;;  %s2703_s14 = smov 33  }
 0x1b1   : > { %1303 = vrot.lane.b32.xlu0 %v1292_v45, %s2693_s28  ;;  %v1102_v45 = vmul.f32 %v2924_v22, %v2839_v44 }
 0x1b2   : > { %v3302_v56 = vpop.permute.xlu1 %636 }
 0x1b3   : > { %v3306_v5 = vpop.permute.xlu0 %988 }
 0x1b4   : > { %4292 = vst [vmem:[#allocation26_spill] sm:$0xff] %v3306_v5  ;;  %1114 = vrot.lane.b32.xlu1 %v1104_v11, %s2687_s22  ;;  %v1136_v11 = vmul.f32 %v3050_v62, %v2997_v60  ;;  %v1386_v5 = vmul.f32 %v2969_v61, %v2997_v60 }
 0x1b5   : > { %1331 = vrot.lane.b32.xlu0 %v1322_v43, %s2694_s29 }
 0x1b6   : > { %v3312_v19 = vpop.permute.xlu1 %664 }
 0x1b7   : > { %v3316_v13 = vpop.permute.xlu0 %1016 }
 0x1b8   : > { %4293 = vst [vmem:[#allocation27_spill] sm:$0xff] %v3316_v13  ;;  %1110 = vrot.lane.b32.xlu1 %v1102_v45, %s2687_s22  ;;  %v1356_v13 = vmul.f32 %v2967_v52, %v3289_v27  ;;  %s2704_s22 = smov 32  }
 0x1b9   : > { %1335 = vrot.lane.b32.xlu0 %v1324_v48, %s2694_s29  ;;  %v1134_v48 = vmul.f32 %v3050_v62, %v2839_v44 }
 0x1ba   : > { %v3322_v30 = vpop.permute.xlu1 %668 }
 0x1bb   : > { %v3326_v43 = vpop.permute.xlu0 %1020 }
 0x1bc   : > { %4294 = vst [vmem:[#allocation28_spill] sm:$0xff] %v3326_v43  ;;  %1146 = vrot.lane.b32.xlu1 %v1136_v11, %s2688_s23  ;;  %v1168_v11 = vmul.f32 %v2931_v25, %v2997_v60 }
 0x1bd   : > { %1363 = vrot.lane.b32.xlu0 %v1354_v37, %s2695_s30 }
 0x1be   : > { %v3332_v22 = vpop.permute.xlu1 %696 }
 0x1bf   : > { %v3336_v45 = vpop.permute.xlu0 %570 }
 0x1c0   : > { %1142 = vrot.lane.b32.xlu1 %v1134_v48, %s2688_s23  ;;  %s2705_s23 = smov 31  }
 0x1c1   : > { %1367 = vrot.lane.b32.xlu0 %v1356_v13, %s2695_s30  ;;  %v1166_v13 = vmul.f32 %v2931_v25, %v2839_v44 }
 0x1c2   : > { %v3342_v43 = vpop.permute.xlu1 %700 }
 0x1c3   : > { %v3346_v37 = vpop.permute.xlu0 %602 }
 0x1c4   : > { %1178 = vrot.lane.b32.xlu1 %v1168_v11, %s2689_s16  ;;  %v1200_v11 = vmul.f32 %v2939_v28, %v2997_v60 }
 0x1c5   : > { %1395 = vrot.lane.b32.xlu0 %v1386_v5, %s2696_s5 }
 0x1c6   : > { %v3352_v62 = vpop.permute.xlu1 %728 }
 0x1c7   : > { %v3356_v48 = vpop.permute.xlu0 %634 }
 0x1c8   : > { %1174 = vrot.lane.b32.xlu1 %v1166_v13, %s2689_s16  ;;  %s2706_s16 = smov 30  }
 0x1c9   : > { %1399 = vrot.lane.b32.xlu0 %v1388_v17, %s2696_s5  ;;  %v1198_v17 = vmul.f32 %v2939_v28, %v2839_v44 }
 0x1ca   : > { %v3362_v59 = vpop.permute.xlu1 %732 }
 0x1cb   : > { %v3366_v5 = vpop.permute.xlu0 %666 }
 0x1cc   : > { %1210 = vrot.lane.b32.xlu1 %v1200_v11, %s2690_s25  ;;  %v1232_v11 = vmul.f32 %v3065_v50, %v2997_v60 }
 0x1cd   : > { %1427 = vrot.lane.b32.xlu0 %v1418_v35, %s2697_s6 }
 0x1ce   : > { %v3372_v25 = vpop.permute.xlu1 %760 }
 0x1cf   : > { %v3376_v13 = vpop.permute.xlu0 %698 }
 0x1d0   : > { %1206 = vrot.lane.b32.xlu1 %v1198_v17, %s2690_s25  ;;  %s2707_s25 = smov 29  }
 0x1d1   : > { %1431 = vrot.lane.b32.xlu0 %v1420_v21, %s2697_s6  ;;  %v1230_v21 = vmul.f32 %v3065_v50, %v2839_v44  ;;  %v1289_v50 = vmul.f32 %v2965_v49, %v2983_v51 }
 0x1d2   : > { %v3382_v54 = vpop.permute.xlu1 %764 }
 0x1d3   : > { %v3386_v35 = vpop.permute.xlu0 %730 }
 0x1d4   : > { %1242 = vrot.lane.b32.xlu1 %v1232_v11, %s2691_s26  ;;  %v1263_v11 = vmul.f32 %v2954_v34, %v2997_v60  ;;  %v1484_v34 = vmul.f32 %v2973_v42, %v3289_v27 }
 0x1d5   : > { %1459 = vrot.lane.b32.xlu0 %v1450_v0, %s2698_s7 }
 0x1d6   : > { %v3392_v28 = vpop.permute.xlu1 %792 }
 0x1d7   : > { %v3396_v17 = vpop.permute.xlu0 %762 }
 0x1d8   : > { %1238 = vrot.lane.b32.xlu1 %v1230_v21, %s2691_s26  ;;  %s2708_s26 = smov 28  }
 0x1d9   : > { %1463 = vrot.lane.b32.xlu0 %v1452_v57, %s2698_s7 }
 0x1da   : > { %v3404_v26 = vpop.permute.xlu1 %796 }
 0x1db   : > { %v3406_v0 = vpop.permute.xlu0 %794 }
 0x1dc   : > { %1270 = vrot.lane.b32.xlu1 %v1263_v11, %s2692_s27  ;;  %v1291_v11 = vmul.f32 %v2965_v49, %v2986_v32  ;;  %v1516_v49 = vmul.f32 %v3104_v2, %v3289_v27  ;;  %s2709_s27 = smov 27  }
 0x1dd   : > { %1491 = vrot.lane.b32.xlu0 %v1482_v41, %s2699_s8 }
 0x1de   : > { %v3412_v44 = vpop.permute.xlu1 %824 }
 0x1df   : > { %v3416_v57 = vpop.permute.xlu0 %1048 }
 0x1e0   : > { %4295 = vst [vmem:[#allocation29_spill] sm:$0xff] %v3416_v57  ;;  %1297 = vrot.lane.b32.xlu1 %v1289_v50, %s2693_s28  ;;  %v1321_v50 = vmul.f32 %v3078_v31, %v2983_v51 }
 0x1e1   : > { %1495 = vrot.lane.b32.xlu0 %v1484_v34, %s2699_s8 }
 0x1e2   : > { %v3422_v21 = vpop.permute.xlu1 %856 }
 0x1e3   : > { %4296 = vst [vmem:[#allocation30_spill] sm:$0xff] %v3422_v21  ;;  %v3426_v41 = vpop.permute.xlu0 %1052 }
 0x1e4   : > { %4297 = vst [vmem:[#allocation31_spill] sm:$0xff] %v3426_v41  ;;  %1301 = vrot.lane.b32.xlu1 %v1291_v11, %s2693_s28  ;;  %v1323_v11 = vmul.f32 %v3078_v31, %v2986_v32  ;;  %v1548_v31 = vmul.f32 %v2975_v9, %v3289_v27  ;;  %s2710_s28 = smov 14  }
 0x1e5   : > { %1523 = vrot.lane.b32.xlu0 %v1514_v12, %s2700_s9 }
 0x1e6   : > { %v3432_v57 = vpop.permute.xlu1 %888 }
 0x1e7   : > { %4298 = vst [vmem:[#allocation32_spill] sm:$0xff] %v3432_v57  ;;  %v3436_v34 = vpop.permute.xlu0 %1080  ;;  %v1546_v57 = vmul.f32 %v2975_v9, %v2997_v60 }
 0x1e8   : > { %4299 = vst [vmem:[#allocation33_spill] sm:$0xff] %v3436_v34  ;;  %1329 = vrot.lane.b32.xlu1 %v1321_v50, %s2694_s29  ;;  %v1353_v50 = vmul.f32 %v2967_v52, %v2983_v51 }
 0x1e9   : > { %1527 = vrot.lane.b32.xlu0 %v1516_v49, %s2700_s9 }
 0x1ea   : > { %v3442_v41 = vpop.permute.xlu1 %920 }
 0x1eb   : > { %4300 = vst [vmem:[#allocation34_spill] sm:$0xff] %v3442_v41  ;;  %v3446_v12 = vpop.permute.xlu0 %1084  ;;  %v1642_v41 = vmul.f32 %v3006_v1, %v2997_v60 }
 0x1ec   : > { %4301 = vst [vmem:[#allocation35_spill] sm:$0xff] %v3446_v12  ;;  %1333 = vrot.lane.b32.xlu1 %v1323_v11, %s2694_s29  ;;  %v1355_v11 = vmul.f32 %v2967_v52, %v2986_v32  ;;  %s2711_s29 = smov 13  }
 0x1ed   : > { %1555 = vrot.lane.b32.xlu0 %v1546_v57, %s2701_s11 }
 0x1ee   : > { %v3452_v34 = vpop.permute.xlu1 %952 }
 0x1ef   : > { %4302 = vst [vmem:[#allocation36_spill] sm:$0xff] %v3452_v34  ;;  %v3456_v49 = vpop.permute.xlu0 %1112  ;;  %v1578_v34 = vmul.f32 %v2978_v38, %v2997_v60 }
 0x1f0   : > { %4303 = vst [vmem:[#allocation37_spill] sm:$0xff] %v3456_v49  ;;  %1361 = vrot.lane.b32.xlu1 %v1353_v50, %s2695_s30  ;;  %v1385_v50 = vmul.f32 %v2969_v61, %v2983_v51 }
 0x1f1   : > { %1559 = vrot.lane.b32.xlu0 %v1548_v31, %s2701_s11 }
 0x1f2   : > { %v3462_v12 = vpop.permute.xlu1 %984 }
 0x1f3   : > { %4304 = vst [vmem:[#allocation38_spill] sm:$0xff] %v3462_v12  ;;  %v3466_v57 = vpop.permute.xlu0 %1116  ;;  %v1580_v12 = vmul.f32 %v2978_v38, %v3289_v27 }
 0x1f4   : > { %4305 = vst [vmem:[#allocation39_spill] sm:$0xff] %v3466_v57  ;;  %1365 = vrot.lane.b32.xlu1 %v1355_v11, %s2695_s30  ;;  %v1387_v11 = vmul.f32 %v2969_v61, %v2986_v32  ;;  %v1612_v61 = vmul.f32 %v3130_v40, %v3289_v27  ;;  %s2712_s30 = smov 12  }
 0x1f5   : > { %1587 = vrot.lane.b32.xlu0 %v1578_v34, %s2702_s12  ;;  %v1610_v34 = vmul.f32 %v3130_v40, %v2997_v60 }
 0x1f6   : > { %v539_v49 = vpop.permute.xlu1 %538 }
 0x1f7   : > { %v3474_v31 = vpop.permute.xlu0 %1144 }
 0x1f8   : > { %4306 = vst [vmem:[#allocation40_spill] sm:$0xff] %v3474_v31  ;;  %1393 = vrot.lane.b32.xlu1 %v1385_v50, %s2696_s5 }
 0x1f9   : > { %1591 = vrot.lane.b32.xlu0 %v1580_v12, %s2702_s12  ;;  %v1417_v12 = vmul.f32 %v3091_v4, %v2983_v51 }
 0x1fa   : > { %v3480_v52 = vpop.permute.xlu1 %826 }
 0x1fb   : > { %v3484_v57 = vpop.permute.xlu0 %1148 }
 0x1fc   : > { %4307 = vst [vmem:[#allocation41_spill] sm:$0xff] %v3484_v57  ;;  %1397 = vrot.lane.b32.xlu1 %v1387_v11, %s2696_s5  ;;  %v1419_v11 = vmul.f32 %v3091_v4, %v2986_v32  ;;  %v1449_v4 = vmul.f32 %v2971_v23, %v2983_v51  ;;  %s2713_s5 = smov 11  }
 0x1fd   : > { %1619 = vrot.lane.b32.xlu0 %v1610_v34, %s2703_s14 }
 0x1fe   : > { %v3490_v31 = vpop.permute.xlu1 %858 }
 0x1ff   : > { %v3494_v50 = vpop.permute.xlu0 %1176 }
 0x200   : > { %4308 = vst [vmem:[#allocation42_spill] sm:$0xff] %v3494_v50  ;;  %1425 = vrot.lane.b32.xlu1 %v1417_v12, %s2697_s6  ;;  %v545_v50 = vsel %vm542_vm5, %v539_v49, %v3244_v63  ;;  %v516_v12 = vmul.f32 %v2843_v46, %v2997_v60 }
 0x201   : > { %1623 = vrot.lane.b32.xlu0 %v1612_v61, %s2703_s14 }
 0x202   : > { %v3500_v57 = vpop.permute.xlu1 %890 }
 0x203   : > { %4309 = vst [vmem:[#allocation43_spill] sm:$0xff] %v3500_v57  ;;  %v3504_v34 = vpop.permute.xlu0 %1180 }
 0x204   : > { %4310 = vst [vmem:[#allocation44_spill] sm:$0xff] %v3504_v34  ;;  %1429 = vrot.lane.b32.xlu1 %v1419_v11, %s2697_s6  ;;  %v544_v34 = vsel %vm542_vm5, %v3240_v10, %v539_v49  ;;  %v1644_v11 = vmul.f32 %v3006_v1, %v3289_v27  ;;  %v1451_v49 = vmul.f32 %v2971_v23, %v2986_v32  ;;  %s2714_s6 = smov 10  }
 0x205   : > { %1651 = vrot.lane.b32.xlu0 %v1642_v41, %s2704_s22  ;;  %v552_v41 = vadd.f32 %v545_v50, %v516_v12  ;;  %v1674_v50 = vmul.f32 %v3016_v6, %v2997_v60 }
 0x206   : > { %v3514_v61 = vpop.permute.xlu1 %922 }
 0x207   : > { %4311 = vst [vmem:[#allocation45_spill] sm:$0xff] %v3514_v61  ;;  %v3520_v57 = vpop.permute.xlu0 %1208  ;;  %v551_v61 = vadd.f32 %v544_v34, %v515_v14  ;;  %v576_v14 = vsel %vm574_vm6, %v3250_v24, %v3336_v45 }
 0x208   : > { %4312 = vst [vmem:[#allocation46_spill] sm:$0xff] %v3520_v57  ;;  %1457 = vrot.lane.b32.xlu1 %v1449_v4, %s2698_s7  ;;  %v577_v57 = vsel %vm574_vm6, %v3336_v45, %v3260_v53  ;;  %v1481_v4 = vmul.f32 %v2973_v42, %v2983_v51 }
 0x209   : > { %1655 = vrot.lane.b32.xlu0 %v1644_v11, %s2704_s22  ;;  %v584_v12 = vadd.f32 %v577_v57, %v552_v41  ;;  %v583_v23 = vadd.f32 %v576_v14, %v551_v61  ;;  %v609_v57 = vsel %vm606_vm7, %v3346_v37, %v3280_v18  ;;  %v1676_v41 = vmul.f32 %v3016_v6, %v3289_v27 }
 0x20a   : > { %v3528_v21 = vpop.permute.xlu1 %954  ;;  %v608_v61 = vsel %vm606_vm7, %v3270_v16, %v3346_v37  ;;  %v1483_v14 = vmul.f32 %v2973_v42, %v2986_v32  ;;  %v517_v37 = vmul.f32 %v2843_v46, %v2986_v32 }
 0x20b   : > { %v3535_v1 = vpop.permute.xlu0 %1212  ;;  %v616_v45 = vadd.f32 %v609_v57, %v584_v12 }
 0x20c   : > { %1461 = vrot.lane.b32.xlu1 %v1451_v49, %s2698_s7  ;;  %v615_v49 = vadd.f32 %v608_v61, %v583_v23  ;;  %v640_v23 = vsel %vm638_vm8, %v3292_v47, %v3356_v48  ;;  %v553_v42 = vadd.f32 %v3244_v63, %v517_v37  ;;  %v672_v63 = vsel %vm670_vm9, %v3312_v19, %v3366_v5  ;;  %s2715_s7 = smov 9  }
 0x20d   : > { %1683 = vrot.lane.b32.xlu0 %v1674_v50, %s2705_s23 }
 0x20e   : > { %v3544_v34 = vpop.permute.xlu1 %986 }
 0x20f   : > { %v3551_v11 = vpop.permute.xlu0 %1240 }
 0x210   : > { %4313 = vst [vmem:[#allocation47_spill] sm:$0xff] %v3551_v11  ;;  %1489 = vrot.lane.b32.xlu1 %v1481_v4, %s2699_s8  ;;  %v641_v11 = vsel %vm638_vm8, %v3356_v48, %v3302_v56  ;;  %v1706_v4 = vmul.f32 %v3143_v33, %v2997_v60  ;;  %v1708_v48 = vmul.f32 %v3143_v33, %v3289_v27 }
 0x211   : > { %1687 = vrot.lane.b32.xlu0 %v1676_v41, %s2705_s23  ;;  %v648_v57 = vadd.f32 %v641_v11, %v616_v45  ;;  %v647_v41 = vadd.f32 %v640_v23, %v615_v49  ;;  %v673_v11 = vsel %vm670_vm9, %v3366_v5, %v3322_v30  ;;  %v1738_v5 = vmul.f32 %v3028_v20, %v2997_v60 }
 0x212   : > { %v3560_v50 = vpop.permute.xlu1 %1018 }
 0x213   : > { %v3567_v12 = vpop.permute.xlu0 %1244  ;;  %v679_v37 = vadd.f32 %v672_v63, %v647_v41 }
 0x214   : > { %4314 = vst [vmem:[#allocation48_spill] sm:$0xff] %v3567_v12  ;;  %1493 = vrot.lane.b32.xlu1 %v1483_v14, %s2699_s8  ;;  %v1513_v12 = vmul.f32 %v3104_v2, %v2983_v51  ;;  %v585_v14 = vadd.f32 %v3260_v53, %v553_v42  ;;  %v705_v53 = vsel %vm702_vm10, %v3376_v13, %v3342_v43  ;;  %s2716_s8 = smov 8  }
 0x215   : > { %1715 = vrot.lane.b32.xlu0 %v1706_v4, %s2706_s16  ;;  %v680_v4 = vadd.f32 %v673_v11, %v648_v57 }
 0x216   : > { %v3579_v61 = vpop.permute.xlu1 %1050  ;;  %v617_v49 = vadd.f32 %v3280_v18, %v585_v14  ;;  %v704_v18 = vsel %vm702_vm10, %v3332_v22, %v3376_v13  ;;  %v1740_v13 = vmul.f32 %v3028_v20, %v3289_v27 }
 0x217   : > { %v3586_v45 = vpop.permute.xlu0 %1268  ;;  %v712_v42 = vadd.f32 %v705_v53, %v680_v4  ;;  %v711_v41 = vadd.f32 %v704_v18, %v679_v37  ;;  %v1547_v53 = vmul.f32 %v2975_v9, %v2986_v32 }
 0x218   : > { %4315 = vst [vmem:[#allocation49_spill] sm:$0xff] %v3586_v45  ;;  %1521 = vrot.lane.b32.xlu1 %v1513_v12, %s2700_s9  ;;  %v1515_v45 = vmul.f32 %v3104_v2, %v2986_v32  ;;  %v649_v57 = vadd.f32 %v3302_v56, %v617_v49  ;;  %v737_v56 = vsel %vm734_vm11, %v3386_v35, %v3362_v59 }
 0x219   : > { %1719 = vrot.lane.b32.xlu0 %v1708_v48, %s2706_s16  ;;  %v1545_v48 = vmul.f32 %v2975_v9, %v2983_v51  ;;  %v744_v4 = vadd.f32 %v737_v56, %v712_v42  ;;  %v543_v56 = vsel %vm542_vm5, %v2990_v58, %v3240_v10  ;;  %vm1022_vm5 = vcmask 719872  }
 0x21a   : > { %v3597_v23 = vpop.permute.xlu1 %1046  ;;  %v681_v2 = vadd.f32 %v3322_v30, %v649_v57  ;;  %v736_v30 = vsel %vm734_vm11, %v3352_v62, %v3386_v35  ;;  %v1770_v35 = vmul.f32 %v3040_v29, %v2997_v60 }
 0x21b   : > { %v3604_v12 = vpop.permute.xlu0 %1272  ;;  %v743_v49 = vadd.f32 %v736_v30, %v711_v41  ;;  %v1577_v41 = vmul.f32 %v2978_v38, %v2983_v51  ;;  %v800_v30 = vsel %vm798_vm13, %v3392_v28, %v3406_v0 }
 0x21c   : > { %1525 = vrot.lane.b32.xlu1 %v1515_v45, %s2700_s9  ;;  %v713_v14 = vadd.f32 %v3342_v43, %v681_v2  ;;  %v769_v43 = vsel %vm766_vm12, %v3396_v17, %v3382_v54  ;;  %s2717_s9 = smov 60  }
 0x21d   : > { %1747 = vrot.lane.b32.xlu0 %v1738_v5, %s2707_s25  ;;  %v776_v42 = vadd.f32 %v769_v43, %v744_v4 }
 0x21e   : > { %v3615_v11 = vpop.permute.xlu1 %1082  ;;  %v745_v63 = vadd.f32 %v3362_v59, %v713_v14  ;;  %v768_v59 = vsel %vm766_vm12, %v3372_v25, %v3396_v17  ;;  %v1772_v17 = vmul.f32 %v3040_v29, %v3289_v27  ;;  %v2572_v14 = vld [vmem:[#allocation2] sm:$0xff] }
 0x21f   : > { %v3622_v45 = vpop.permute.xlu0 %1299  ;;  %v775_v18 = vadd.f32 %v768_v59, %v743_v49  ;;  %v514_v4 = vmul.f32 %v2572_v14, %v2843_v46  ;;  %v4318_v14 = vld [vmem:[#allocation23_spill] sm:$0xff] }
 0x220   : > { %1553 = vrot.lane.b32.xlu1 %v1545_v48, %s2701_s11  ;;  %v777_v57 = vadd.f32 %v3382_v54, %v745_v63  ;;  %v801_v54 = vsel %vm798_vm13, %v3406_v0, %v3404_v26  ;;  %v575_v63 = vsel %vm574_vm6, %v3117_v36, %v3250_v24  ;;  %v833_v0 = vsel %vm830_vm14, %v3480_v52, %v3254_v15 }
 0x221   : > { %1751 = vrot.lane.b32.xlu0 %v1740_v13, %s2707_s25  ;;  %v808_v13 = vadd.f32 %v801_v54, %v776_v42  ;;  %v807_v10 = vadd.f32 %v800_v30, %v775_v18  ;;  %v550_v46 = vadd.f32 %v543_v56, %v514_v4  ;;  %v607_v36 = vsel %vm606_vm7, %v3062_v8, %v3270_v16  ;;  %v4316_v54 = vld [vmem:[#allocation30_spill] sm:$0xff] }
 0x222   : > { %v3633_v37 = vpop.permute.xlu1 %1078  ;;  %v809_v9 = vadd.f32 %v3404_v26, %v777_v57  ;;  %v1579_v26 = vmul.f32 %v2978_v38, %v2986_v32  ;;  %v1802_v38 = vmul.f32 %v3156_v39, %v2997_v60  ;;  %v639_v57 = vsel %vm638_vm8, %v3074_v55, %v3292_v47  ;;  %v4317_v56 = vld [vmem:[#allocation6_spill] sm:$0xff] }
 0x223   : > { %v3640_v5 = vpop.permute.xlu0 %1303  ;;  %v840_v24 = vadd.f32 %v833_v0, %v808_v13  ;;  %v582_v43 = vadd.f32 %v575_v63, %v550_v46  ;;  %v1804_v18 = vmul.f32 %v3156_v39, %v3289_v27  ;;  %v671_v55 = vsel %vm670_vm9, %v3088_v3, %v3312_v19  ;;  %v4322_v0 = vld [vmem:[#allocation32_spill] sm:$0xff] }
 0x224   : > { %1557 = vrot.lane.b32.xlu1 %v1547_v53, %s2701_s11  ;;  %v841_v58 = vadd.f32 %v3254_v15, %v809_v9  ;;  %v1609_v15 = vmul.f32 %v3130_v40, %v2983_v51  ;;  %v703_v13 = vsel %vm702_vm10, %v4317_v56, %v3332_v22  ;;  %vm1054_vm6 = vcmask 711680  }
 0x225   : > { %1779 = vrot.lane.b32.xlu0 %v1770_v35, %s2708_s26  ;;  %v832_v35 = vsel %vm830_vm14, %v3412_v44, %v3480_v52  ;;  %v614_v59 = vadd.f32 %v607_v36, %v582_v43  ;;  %v865_v52 = vsel %vm862_vm15, %v3490_v31, %v3266_v7  ;;  %v4323_v36 = vld [vmem:[#allocation4_spill] sm:$0xff]  ;;  %vm1086_vm7 = vcmask 703488  }
 0x226   : > { %v3651_v2 = vpop.permute.xlu1 %1114  ;;  %v873_v8 = vadd.f32 %v3266_v7, %v841_v58  ;;  %v839_v16 = vadd.f32 %v832_v35, %v807_v10  ;;  %v872_v47 = vadd.f32 %v865_v52, %v840_v24  ;;  %v1611_v7 = vmul.f32 %v3130_v40, %v2986_v32  ;;  %v4320_v58 = vld [vmem:[#allocation5_spill] sm:$0xff]  ;;  %v4321_v40 = vld [vmem:[#allocation7_spill] sm:$0xff]  ;;  %v4325_v35 = vld [vmem:[#allocation24_spill] sm:$0xff] }
 0x227   : > { %v3658_v48 = vpop.permute.xlu0 %1331  ;;  %v1834_v32 = vmul.f32 %v4320_v58, %v2997_v60  ;;  %v735_v22 = vsel %vm734_vm11, %v4321_v40, %v3352_v62  ;;  %v1641_v24 = vmul.f32 %v4323_v36, %v2983_v51  ;;  %v4324_v60 = vld [vmem:[#allocation8_spill] sm:$0xff]  ;;  %v1836_v51 = vmul.f32 %v4320_v58, %v3289_v27  ;;  %v3778_v40 = vld [vmem:[#allocation2 + $0x10] sm:$0xff] }
 0x228   : > { %1585 = vrot.lane.b32.xlu1 %v1577_v41, %s2702_s12  ;;  %v646_v41 = vadd.f32 %v639_v57, %v614_v59  ;;  %v905_v4 = vadd.f32 %v4318_v14, %v873_v8  ;;  %v767_v43 = vsel %vm766_vm12, %v4324_v60, %v3372_v25  ;;  %vm1118_vm8 = vcmask 695296  }
 0x229   : > { %1783 = vrot.lane.b32.xlu0 %v1772_v17, %s2708_s26  ;;  %v864_v17 = vsel %vm862_vm15, %v4316_v54, %v3490_v31  ;;  %vm1150_vm9 = vcmask 687104   ;;  %vm1182_vm10 = vcmask 580608   ;;  %vm1214_vm11 = vcmask 572416  }
 0x22a   : > { %v3677_v49 = vpop.permute.xlu1 %1110  ;;  %v871_v3 = vadd.f32 %v864_v17, %v839_v16  ;;  %v678_v30 = vadd.f32 %v671_v55, %v646_v41  ;;  %v937_v62 = vadd.f32 %v4325_v35, %v905_v4  ;;  %v4326_v16 = vld [vmem:[#allocation45_spill] sm:$0xff]  ;;  %v4328_v41 = vld [vmem:[#allocation34_spill] sm:$0xff]  ;;  %vm1246_vm12 = vcmask 564224  }
 0x22b   : > { %v3682_v53 = vpop.permute.xlu0 %1335  ;;  %v929_v59 = vsel %vm926_vm2, %v4326_v16, %v4325_v35  ;;  %v928_v17 = vsel %vm926_vm2, %v4328_v41, %v4326_v16  ;;  %v4330_v4 = vld [vmem:[#allocation10_spill] sm:$0xff] }
 0x22c   : > { %1589 = vrot.lane.b32.xlu1 %v1579_v26, %s2702_s12  ;;  %v4319_v26 = vld [vmem:[#allocation43_spill] sm:$0xff]  ;;  %v710_v46 = vadd.f32 %v703_v13, %v678_v30  ;;  %v4329_v13 = vld [vmem:[#allocation25_spill] sm:$0xff] }
 0x22d   : > { %1811 = vrot.lane.b32.xlu0 %v1802_v38, %s2709_s27  ;;  %v897_v31 = vsel %vm894_vm1, %v4319_v26, %v4318_v14  ;;  %v896_v38 = vsel %vm894_vm1, %v4322_v0, %v4319_v26  ;;  %v969_v14 = vadd.f32 %v4329_v13, %v937_v62  ;;  %v4334_v62 = vld [vmem:[#allocation26_spill] sm:$0xff] }
 0x22e   : > { %v3700_v42 = vpop.permute.xlu1 %1146  ;;  %v904_v10 = vadd.f32 %v897_v31, %v872_v47  ;;  %v742_v8 = vadd.f32 %v735_v22, %v710_v46  ;;  %v961_v31 = vsel %vm958_vm3, %v3528_v21, %v4329_v13  ;;  %v4331_v22 = vld [vmem:[#allocation12_spill] sm:$0xff]  ;;  %v4332_v46 = vld [vmem:[#allocation11_spill] sm:$0xff] }
 0x22f   : > { %v3705_v9 = vpop.permute.xlu0 %1363 }
 0x230   : > { %1617 = vrot.lane.b32.xlu1 %v1609_v15, %s2703_s14  ;;  %v903_v15 = vadd.f32 %v896_v38, %v871_v3  ;;  %v936_v55 = vadd.f32 %v929_v59, %v904_v10  ;;  %v774_v47 = vadd.f32 %v767_v43, %v742_v8  ;;  %v1866_v10 = vmul.f32 %v3778_v40, %v4331_v22  ;;  %v3790_v43 = vld [vmem:[#allocation2 + $0x8] sm:$0xff] }
 0x231   : > { %1815 = vrot.lane.b32.xlu0 %v1804_v18, %s2709_s27  ;;  %v4327_v18 = vld [vmem:[#allocation9_spill] sm:$0xff]  ;;  %v1673_v35 = vmul.f32 %v3790_v43, %v3016_v6 }
 0x232   : > { %v3723_v19 = vpop.permute.xlu1 %1142  ;;  %v799_v25 = vsel %vm798_vm13, %v4327_v18, %v3392_v28  ;;  %v831_v28 = vsel %vm830_vm14, %v4330_v4, %v3412_v44  ;;  %v935_v3 = vadd.f32 %v928_v17, %v903_v15  ;;  %v863_v44 = vsel %vm862_vm15, %v4332_v46, %v4316_v54  ;;  %v4335_v54 = vld [vmem:[#allocation13_spill] sm:$0xff]  ;;  %v4338_v4 = vld [vmem:[#allocation28_spill] sm:$0xff] }
 0x233   : > { %v3728_v63 = vpop.permute.xlu0 %1367  ;;  %v806_v26 = vadd.f32 %v799_v25, %v774_v47  ;;  %v968_v38 = vadd.f32 %v961_v31, %v936_v55  ;;  %v1001_v15 = vadd.f32 %v4334_v62, %v969_v14  ;;  %v895_v8 = vsel %vm894_vm1, %v4335_v54, %v4322_v0  ;;  %v4336_v55 = vld [vmem:[#allocation15_spill] sm:$0xff] }
 0x234   : > { %1621 = vrot.lane.b32.xlu1 %v1611_v7, %s2703_s14  ;;  %v3763_v7 = vld [vmem:[#allocation2 + $0x18] sm:$0xff]  ;;  %v1868_v25 = vmul.f32 %v4331_v22, %v3289_v27  ;;  %v927_v47 = vsel %vm926_vm2, %v4336_v55, %v4328_v41  ;;  %vm1274_vm13 = vcmask 556032   ;;  %vm1305_vm14 = vcmask 547840  }
 0x235   : > { %1843 = vrot.lane.b32.xlu0 %v1834_v32, %s2710_s28  ;;  %v1643_v56 = vmul.f32 %v3763_v7, %v4323_v36  ;;  %v838_v36 = vadd.f32 %v831_v28, %v806_v26  ;;  %v1675_v14 = vmul.f32 %v3763_v7, %v3016_v6  ;;  %v1033_v28 = vadd.f32 %v4338_v4, %v1001_v15  ;;  %v4343_v54 = vld [vmem:[#allocation27_spill] sm:$0xff] }
 0x236   : > { %v3746_v57 = vpop.permute.xlu1 %1178  ;;  %vm1337_vm15 = vcmask 539648   ;;  %vm1369_vm1 = vcmask 531456   ;;  %vm1401_vm2 = vcmask 424960  }
 0x237   : > { %v3751_v52 = vpop.permute.xlu0 %1395 }
 0x238   : > { %1649 = vrot.lane.b32.xlu1 %v1641_v24, %s2704_s22  ;;  %v4333_v24 = vld [vmem:[#allocation36_spill] sm:$0xff] }
 0x239   : > { %1847 = vrot.lane.b32.xlu0 %v1836_v51, %s2710_s28  ;;  %v960_v60 = vsel %vm958_vm3, %v4333_v24, %v3528_v21  ;;  %v870_v51 = vadd.f32 %v863_v44, %v838_v36  ;;  %v993_v21 = vsel %vm990_vm4, %v3544_v34, %v4334_v62  ;;  %v4340_v44 = vld [vmem:[#allocation14_spill] sm:$0xff]  ;;  %v4341_v36 = vld [vmem:[#allocation19_spill] sm:$0xff] }
 0x23a   : > { %v3771_v30 = vpop.permute.xlu1 %1174  ;;  %v967_v16 = vadd.f32 %v960_v60, %v935_v3  ;;  %v1000_v17 = vadd.f32 %v993_v21, %v968_v38  ;;  %v4339_v3 = vld [vmem:[#allocation17_spill] sm:$0xff]  ;;  %v1898_v6 = vmul.f32 %v3778_v40, %v4340_v44  ;;  %v1705_v38 = vmul.f32 %v3790_v43, %v3143_v33 }
 0x23b   : > { %v3776_v32 = vpop.permute.xlu0 %1399  ;;  %v902_v0 = vadd.f32 %v895_v8, %v870_v51  ;;  %v959_v41 = vsel %vm958_vm3, %v4339_v3, %v4333_v24  ;;  %v1024_v8 = vsel %vm1022_vm5, %v4343_v54, %v3560_v50  ;;  %v1707_v21 = vmul.f32 %v3763_v7, %v3143_v33 }
 0x23c   : > { %1653 = vrot.lane.b32.xlu1 %v1643_v56, %s2704_s22  ;;  %v4337_v56 = vld [vmem:[#allocation38_spill] sm:$0xff]  ;;  %v1900_v33 = vmul.f32 %v4340_v44, %v3289_v27  ;;  %vm1433_vm3 = vcmask 416768  }
 0x23d   : > { %1875 = vrot.lane.b32.xlu0 %v1866_v10, %s2711_s29  ;;  %v992_v13 = vsel %vm990_vm4, %v4337_v56, %v3544_v34  ;;  %v934_v10 = vadd.f32 %v927_v47, %v902_v0  ;;  %v1025_v34 = vsel %vm1022_vm5, %v3560_v50, %v4338_v4  ;;  %v991_v24 = vsel %vm990_vm4, %v4341_v36, %v4337_v56  ;;  %v4345_v0 = vld [vmem:[#allocation29_spill] sm:$0xff]  ;;  %v4350_v36 = vld [vmem:[#allocation39_spill] sm:$0xff] }
 0x23e   : > { %v3798_v59 = vpop.permute.xlu1 %1210  ;;  %v999_v26 = vadd.f32 %v992_v13, %v967_v16  ;;  %v1032_v60 = vadd.f32 %v1025_v34, %v1000_v17  ;;  %v4344_v16 = vld [vmem:[#allocation31_spill] sm:$0xff]  ;;  %v1737_v17 = vmul.f32 %v3790_v43, %v3028_v20  ;;  %v1056_v56 = vsel %vm1054_vm6, %v4345_v0, %v3579_v61  ;;  %v4349_v34 = vld [vmem:[#allocation33_spill] sm:$0xff] }
 0x23f   : > { %v3803_v18 = vpop.permute.xlu0 %1427  ;;  %v966_v15 = vadd.f32 %v959_v41, %v934_v10  ;;  %v1057_v51 = vsel %vm1054_vm6, %v3579_v61, %v4344_v16  ;;  %v4346_v13 = vld [vmem:[#allocation35_spill] sm:$0xff]  ;;  %v4347_v41 = vld [vmem:[#allocation18_spill] sm:$0xff]  ;;  %v4348_v61 = vld [vmem:[#allocation21_spill] sm:$0xff]  ;;  %vm1465_vm4 = vcmask 408576  }
 0x240   : > { %1681 = vrot.lane.b32.xlu1 %v1673_v35, %s2705_s23  ;;  %v4342_v35 = vld [vmem:[#allocation16_spill] sm:$0xff]  ;;  %v1031_v55 = vadd.f32 %v1024_v8, %v999_v26  ;;  %v3867_v26 = vmul.f32 %v3778_v40, %v4347_v41  ;;  %v1023_v10 = vsel %vm1022_vm5, %v4348_v61, %v4343_v54  ;;  %v4352_v61 = vld [vmem:[#allocation41_spill] sm:$0xff]  ;;  %vm1497_vm5 = vcmask 400384  }
 0x241   : > { %1879 = vrot.lane.b32.xlu0 %v1868_v25, %s2711_s29  ;;  %v1930_v62 = vmul.f32 %v3778_v40, %v4342_v35  ;;  %v1065_v25 = vadd.f32 %v4344_v16, %v1033_v28  ;;  %v998_v50 = vadd.f32 %v991_v24, %v966_v15  ;;  %v1064_v28 = vadd.f32 %v1057_v51, %v1032_v60  ;;  %v4351_v51 = vld [vmem:[#allocation37_spill] sm:$0xff] }
 0x242   : > { %v3821_v31 = vpop.permute.xlu1 %1206  ;;  %v1932_v3 = vmul.f32 %v4342_v35, %v3289_v27  ;;  %v1121_v24 = vsel %vm1118_vm8, %v3651_v2, %v4350_v36  ;;  %v1063_v60 = vadd.f32 %v1056_v56, %v1031_v55  ;;  %v1055_v15 = vsel %vm1054_vm6, %v3597_v23, %v4345_v0 }
 0x243   : > { %v3826_v46 = vpop.permute.xlu0 %1431  ;;  %v1030_v16 = vadd.f32 %v1023_v10, %v998_v50  ;;  %v1153_v35 = vsel %vm1150_vm9, %v3700_v42, %v4352_v61  ;;  %v1087_v23 = vsel %vm1086_vm7, %v3633_v37, %v4349_v34  ;;  %v1119_v37 = vsel %vm1118_vm8, %v3677_v49, %v4351_v51 }
 0x244   : > { %1685 = vrot.lane.b32.xlu1 %v1675_v14, %s2705_s23  ;;  %v1089_v14 = vsel %vm1086_vm7, %v3615_v11, %v4346_v13  ;;  %vm1529_vm6 = vcmask 392192  }
 0x245   : > { %1907 = vrot.lane.b32.xlu0 %v1898_v6, %s2712_s30  ;;  %v1088_v6 = vsel %vm1086_vm7, %v4349_v34, %v3615_v11  ;;  %v1096_v8 = vadd.f32 %v1089_v14, %v1064_v28  ;;  %v1120_v11 = vsel %vm1118_vm8, %v4351_v51, %v3651_v2  ;;  %v1062_v50 = vadd.f32 %v1055_v15, %v1030_v16  ;;  %v4353_v2 = vld [vmem:[#allocation40_spill] sm:$0xff] }
 0x246   : > { %v3848_v47 = vpop.permute.xlu1 %1242  ;;  %v1095_v55 = vadd.f32 %v1088_v6, %v1063_v60  ;;  %v1152_v56 = vsel %vm1150_vm9, %v4353_v2, %v3700_v42  ;;  %v4355_v42 = vld [vmem:[#allocation42_spill] sm:$0xff]  ;;  %v1151_v49 = vsel %vm1150_vm9, %v3723_v19, %v4353_v2  ;;  %v4357_v16 = vld [vmem:[#allocation48_spill] sm:$0xff]  ;;  %vm1561_vm7 = vcmask 384000  }
 0x247   : > { %v3858_v4 = vpop.permute.xlu0 %1459  ;;  %v1128_v0 = vadd.f32 %v1121_v24, %v1096_v8  ;;  %v1094_v6 = vadd.f32 %v1087_v23, %v1062_v50  ;;  %v1217_v24 = vsel %vm1214_vm11, %v3798_v59, %v3535_v1  ;;  %v1249_v51 = vsel %vm1246_vm12, %v3848_v47, %v4357_v16 }
 0x248   : > { %1713 = vrot.lane.b32.xlu1 %v1705_v38, %s2706_s16  ;;  %v1097_v38 = vadd.f32 %v4346_v13, %v1065_v25  ;;  %v4354_v13 = vld [vmem:[#allocation44_spill] sm:$0xff]  ;;  %v1127_v10 = vadd.f32 %v1120_v11, %v1095_v55  ;;  %v1739_v11 = vmul.f32 %v3763_v7, %v3028_v20  ;;  %vm1593_vm8 = vcmask 375808  }
 0x249   : > { %1911 = vrot.lane.b32.xlu0 %v1900_v33, %s2712_s30  ;;  %v1185_v14 = vsel %vm1182_vm10, %v3746_v57, %v4354_v13  ;;  %v1126_v15 = vadd.f32 %v1119_v37, %v1094_v6  ;;  %vm1625_vm9 = vcmask 269312  }
 0x24a   : > { %v1239_v54 = vpop.permute.xlu1 %1238  ;;  %v1129_v25 = vadd.f32 %v4350_v36, %v1097_v38  ;;  %v1184_v36 = vsel %vm1182_vm10, %v4355_v42, %v3746_v57  ;;  %v1159_v60 = vadd.f32 %v1152_v56, %v1127_v10  ;;  %v4356_v57 = vld [vmem:[#allocation46_spill] sm:$0xff] }
 0x24b   : > { %v3889_v33 = vpop.permute.xlu0 %1463  ;;  %v1216_v8 = vsel %vm1214_vm11, %v4356_v57, %v3798_v59  ;;  %v1158_v23 = vadd.f32 %v1151_v49, %v1126_v15  ;;  %v4358_v59 = vld [vmem:[#allocation47_spill] sm:$0xff]  ;;  %v1771_v15 = vmul.f32 %v3763_v7, %v3040_v29 }
 0x24c   : > { %1717 = vrot.lane.b32.xlu1 %v1707_v21, %s2706_s16  ;;  %v1161_v28 = vadd.f32 %v4352_v61, %v1129_v25  ;;  %v1160_v21 = vadd.f32 %v1153_v35, %v1128_v0  ;;  %v1191_v19 = vadd.f32 %v1184_v36, %v1159_v60  ;;  %v1248_v0 = vsel %vm1246_vm12, %v4358_v59, %v3848_v47 }
 0x24d   : > { %1939 = vrot.lane.b32.xlu0 %v1930_v62, %s2713_s5  ;;  %v1247_v37 = vsel %vm1246_vm12, %v1239_v54, %v4358_v59  ;;  %vm1721_vm12 = vcmask 244736  }
 0x24e   : > { %v1271_v34 = vpop.permute.xlu1 %1270  ;;  %v1193_v62 = vadd.f32 %v4354_v13, %v1161_v28  ;;  %v1192_v35 = vadd.f32 %v1185_v14, %v1160_v21  ;;  %v1223_v20 = vadd.f32 %v1216_v8, %v1191_v19  ;;  %v4359_v13 = vld [vmem:[#allocation49_spill] sm:$0xff]  ;;  %v1964_v14 = vmul.f32 %v4347_v41, %v3289_v27 }
 0x24f   : > { %v3913_v38 = vpop.permute.xlu0 %1491  ;;  %v1275_v47 = vsel %vm1274_vm13, %v4359_v13, %v1271_v34  ;;  %v1769_v28 = vmul.f32 %v3790_v43, %v3040_v29  ;;  %v1801_v29 = vmul.f32 %v3790_v43, %v3156_v39 }
 0x250   : > { %1745 = vrot.lane.b32.xlu1 %v1737_v17, %s2707_s25  ;;  %v1225_v61 = vadd.f32 %v3535_v1, %v1193_v62  ;;  %v1183_v17 = vsel %vm1182_vm10, %v3771_v30, %v4355_v42  ;;  %v1224_v25 = vadd.f32 %v1217_v24, %v1192_v35  ;;  %v1215_v30 = vsel %vm1214_vm11, %v3821_v31, %v4356_v57 }
 0x251   : > { %1943 = vrot.lane.b32.xlu0 %v1932_v3, %s2713_s5  ;;  %v1276_v3 = vsel %vm1274_vm13, %v1271_v34, %v3604_v12  ;;  %v1190_v56 = vadd.f32 %v1183_v17, %v1158_v23  ;;  %v1255_v31 = vadd.f32 %v1248_v0, %v1223_v20  ;;  %vm1657_vm10 = vcmask 261120  }
 0x252   : > { %v1298_v55 = vpop.permute.xlu1 %1297  ;;  %v1257_v1 = vadd.f32 %v4357_v16, %v1225_v61  ;;  %v1256_v2 = vadd.f32 %v1249_v51, %v1224_v25  ;;  %vm1689_vm11 = vcmask 252928   ;;  %vm1753_vm13 = vcmask 236544  }
 0x253   : > { %v3938_v50 = vpop.permute.xlu0 %1495  ;;  %v1222_v42 = vadd.f32 %v1215_v30, %v1190_v56  ;;  %v1306_v34 = vsel %vm1305_vm14, %v1298_v55, %v3622_v45  ;;  %v1282_v62 = vadd.f32 %v1275_v47, %v1255_v31  ;;  %v4361_v30 = vld [vmem:[#allocation22_spill] sm:$0xff] }
 0x254   : > { %1749 = vrot.lane.b32.xlu1 %v1739_v11, %s2707_s25  ;;  %v1284_v10 = vadd.f32 %v3604_v12, %v1257_v1  ;;  %v1283_v21 = vadd.f32 %v1276_v3, %v1256_v2  ;;  %v1803_v1 = vmul.f32 %v3763_v7, %v3156_v39 }
 0x255   : > { %1971 = vrot.lane.b32.xlu0 %v3867_v26, %s2714_s6  ;;  %v1254_v54 = vadd.f32 %v1247_v37, %v1222_v42  ;;  %v1314_v49 = vadd.f32 %v1306_v34, %v1282_v62 }
 0x256   : > { %v1302_v6 = vpop.permute.xlu1 %1301 }
 0x257   : > { %v3958_v36 = vpop.permute.xlu0 %1523  ;;  %v1307_v26 = vsel %vm1305_vm14, %v3622_v45, %v1302_v6  ;;  %v1308_v24 = vsel %vm1305_vm14, %v1302_v6, %v3640_v5  ;;  %v4360_v5 = vld [vmem:[#allocation20_spill] sm:$0xff]  ;;  %v1281_v51 = vadd.f32 %v4359_v13, %v1254_v54  ;;  %v1833_v13 = vmul.f32 %v3790_v43, %v4320_v58 }
 0x258   : > { %v1315_v12 = vadd.f32 %v1307_v26, %v1283_v21  ;;  %v1316_v60 = vadd.f32 %v1308_v24, %v1284_v10  ;;  %1777 = vrot.lane.b32.xlu1 %v1769_v28, %s2708_s26  ;;  %v1994_v8 = vmul.f32 %v3778_v40, %v4360_v5  ;;  %v1996_v23 = vmul.f32 %v4360_v5, %v3289_v27  ;;  %v2576_v28 = vld [vmem:[#allocation2 + $0x20] sm:$0xff] }
 0x259   : > { %1975 = vrot.lane.b32.xlu0 %v1964_v14, %s2714_s6  ;;  %v1313_v61 = vadd.f32 %v1298_v55, %v1281_v51  ;;  %v2026_v27 = vmul.f32 %v3778_v40, %v4361_v30  ;;  %v2028_v40 = vmul.f32 %v2576_v28, %v4361_v30  ;;  %v1835_v21 = vmul.f32 %v3763_v7, %v4320_v58 }
 0x25a   : > { %v1330_v35 = vpop.permute.xlu1 %1329  ;;  %v1865_v26 = vmul.f32 %v3790_v43, %v4331_v22  ;;  %vm1785_vm14 = vcmask 228352  }
 0x25b   : > { %v3968_v57 = vpop.permute.xlu0 %1527  ;;  %v1338_v45 = vsel %vm1337_vm15, %v1330_v35, %v3658_v48  ;;  %v1345_v3 = vadd.f32 %v1330_v35, %v1313_v61 }
 0x25c   : > { %v1346_v16 = vadd.f32 %v1338_v45, %v1314_v49  ;;  %1781 = vrot.lane.b32.xlu1 %v1771_v15, %s2708_s26  ;;  %v1867_v49 = vmul.f32 %v3763_v7, %v4331_v22 }
 0x25d   : > { %2003 = vrot.lane.b32.xlu0 %v1994_v8, %s2715_s7 }
 0x25e   : > { %v1334_v11 = vpop.permute.xlu1 %1333 }
 0x25f   : > { %v3979_v19 = vpop.permute.xlu0 %1555  ;;  %v1339_v17 = vsel %vm1337_vm15, %v3658_v48, %v1334_v11  ;;  %v1340_v25 = vsel %vm1337_vm15, %v1334_v11, %v3682_v53  ;;  %vm1817_vm15 = vcmask 220160  }
 0x260   : > { %v1347_v59 = vadd.f32 %v1339_v17, %v1315_v12  ;;  %v1348_v0 = vadd.f32 %v1340_v25, %v1316_v60  ;;  %1809 = vrot.lane.b32.xlu1 %v1801_v29, %s2709_s27  ;;  %v1899_v17 = vmul.f32 %v3763_v7, %v4340_v44 }
 0x261   : > { %2007 = vrot.lane.b32.xlu0 %v1996_v23, %s2715_s7 }
 0x262   : > { %v1362_v55 = vpop.permute.xlu1 %1361 }
 0x263   : > { %v3991_v20 = vpop.permute.xlu0 %1559  ;;  %v1370_v48 = vsel %vm1369_vm1, %v1362_v55, %v3705_v9  ;;  %v1377_v53 = vadd.f32 %v1362_v55, %v1345_v3 }
 0x264   : > { %v1378_v2 = vadd.f32 %v1370_v48, %v1346_v16  ;;  %1813 = vrot.lane.b32.xlu1 %v1803_v1, %s2709_s27 }
 0x265   : > { %2035 = vrot.lane.b32.xlu0 %v2026_v27, %s2716_s8 }
 0x266   : > { %v1366_v56 = vpop.permute.xlu1 %1365 }
 0x267   : > { %v4001_v39 = vpop.permute.xlu0 %1587  ;;  %v1371_v47 = vsel %vm1369_vm1, %v3705_v9, %v1366_v56  ;;  %v1372_v14 = vsel %vm1369_vm1, %v1366_v56, %v3728_v63  ;;  %vm1849_vm1 = vcmask 113664  }
 0x268   : > { %v1379_v10 = vadd.f32 %v1371_v47, %v1347_v59  ;;  %v1380_v31 = vadd.f32 %v1372_v14, %v1348_v0  ;;  %1841 = vrot.lane.b32.xlu1 %v1833_v13, %s2710_s28  ;;  %v4362_v0 = vld [vmem:[#allocation16_spill] sm:$0xff]  ;;  %v1961_v47 = vmul.f32 %v3790_v43, %v4347_v41 }
 0x269   : > { %2039 = vrot.lane.b32.xlu0 %v2028_v40, %s2716_s8  ;;  %v1931_v27 = vmul.f32 %v3763_v7, %v4362_v0 }
 0x26a   : > { %v1394_v37 = vpop.permute.xlu1 %1393 }
 0x26b   : > { %v4012_v6 = vpop.permute.xlu0 %1591  ;;  %v1402_v9 = vsel %vm1401_vm2, %v1394_v37, %v3751_v52  ;;  %v1409_v42 = vadd.f32 %v1394_v37, %v1377_v53  ;;  %v1963_v37 = vmul.f32 %v3763_v7, %v4347_v41 }
 0x26c   : > { %v1410_v63 = vadd.f32 %v1402_v9, %v1378_v2  ;;  %1845 = vrot.lane.b32.xlu1 %v1835_v21, %s2710_s28 }
 0x26e   : > { %v1398_v34 = vpop.permute.xlu1 %1397 }
 0x26f   : > { %v4018_v24 = vpop.permute.xlu0 %1619  ;;  %v1403_v62 = vsel %vm1401_vm2, %v3751_v52, %v1398_v34  ;;  %v1404_v12 = vsel %vm1401_vm2, %v1398_v34, %v3776_v32  ;;  %v1897_v32 = vmul.f32 %v3790_v43, %v4340_v44  ;;  %vm1881_vm2 = vcmask 105472  }
 0x270   : > { %v1411_v60 = vadd.f32 %v1403_v62, %v1379_v10  ;;  %v1412_v58 = vadd.f32 %v1404_v12, %v1380_v31  ;;  %1873 = vrot.lane.b32.xlu1 %v1865_v26, %s2711_s29 }
 0x272   : > { %v1426_v54 = vpop.permute.xlu1 %1425 }
 0x273   : > { %v1434_v35 = vsel %vm1433_vm3, %v1426_v54, %v3803_v18  ;;  %v1441_v15 = vadd.f32 %v1426_v54, %v1409_v42  ;;  %v4026_v45 = vpop.permute.xlu0 %1623 }
 0x274   : > { %v1442_v8 = vadd.f32 %v1434_v35, %v1410_v63  ;;  %1877 = vrot.lane.b32.xlu1 %v1867_v49, %s2711_s29 }
 0x276   : > { %v1430_v52 = vpop.permute.xlu1 %1429 }
 0x277   : > { %v1435_v16 = vsel %vm1433_vm3, %v3803_v18, %v1430_v52  ;;  %v1436_v51 = vsel %vm1433_vm3, %v1430_v52, %v3826_v46  ;;  %v4034_v22 = vpop.permute.xlu0 %1651  ;;  %v1929_v46 = vmul.f32 %v3790_v43, %v4362_v0  ;;  %vm1913_vm3 = vcmask 97280  }
 0x278   : > { %v1443_v11 = vadd.f32 %v1435_v16, %v1411_v60  ;;  %v1444_v29 = vadd.f32 %v1436_v51, %v1412_v58  ;;  %1905 = vrot.lane.b32.xlu1 %v1897_v32, %s2712_s30  ;;  %v1995_v58 = vmul.f32 %v3763_v7, %v4360_v5  ;;  %v2027_v51 = vmul.f32 %v3763_v7, %v4361_v30 }
 0x27a   : > { %v1458_v61 = vpop.permute.xlu1 %1457 }
 0x27b   : > { %v1466_v25 = vsel %vm1465_vm4, %v1458_v61, %v3858_v4  ;;  %v1473_v23 = vadd.f32 %v1458_v61, %v1441_v15  ;;  %v4044_v1 = vpop.permute.xlu0 %1655 }
 0x27c   : > { %v1474_v59 = vadd.f32 %v1466_v25, %v1442_v8  ;;  %1909 = vrot.lane.b32.xlu1 %v1899_v17, %s2712_s30 }
 0x27e   : > { %v1462_v18 = vpop.permute.xlu1 %1461 }
 0x27f   : > { %v1467_v3 = vsel %vm1465_vm4, %v3858_v4, %v1462_v18  ;;  %v1468_v55 = vsel %vm1465_vm4, %v1462_v18, %v3889_v33  ;;  %v4051_v4 = vpop.permute.xlu0 %1683  ;;  %vm1945_vm4 = vcmask 89088  }
 0x280   : > { %v1475_v48 = vadd.f32 %v1467_v3, %v1443_v11  ;;  %v1476_v53 = vadd.f32 %v1468_v55, %v1444_v29  ;;  %1937 = vrot.lane.b32.xlu1 %v1929_v46, %s2713_s5 }
 0x282   : > { %v1490_v44 = vpop.permute.xlu1 %1489 }
 0x283   : > { %v1498_v2 = vsel %vm1497_vm5, %v1490_v44, %v3913_v38  ;;  %v1505_v56 = vadd.f32 %v1490_v44, %v1473_v23  ;;  %v4061_v42 = vpop.permute.xlu0 %1687 }
 0x284   : > { %v1506_v13 = vadd.f32 %v1498_v2, %v1474_v59  ;;  %1941 = vrot.lane.b32.xlu1 %v1931_v27, %s2713_s5 }
 0x286   : > { %v1494_v33 = vpop.permute.xlu1 %1493 }
 0x287   : > { %v1499_v14 = vsel %vm1497_vm5, %v3913_v38, %v1494_v33  ;;  %v1500_v28 = vsel %vm1497_vm5, %v1494_v33, %v3938_v50  ;;  %v1993_v50 = vmul.f32 %v3790_v43, %v4360_v5  ;;  %v4069_v41 = vpop.permute.xlu0 %1715  ;;  %vm1977_vm5 = vcmask 80896  }
 0x288   : > { %v1507_v40 = vadd.f32 %v1499_v14, %v1475_v48  ;;  %v1508_v10 = vadd.f32 %v1500_v28, %v1476_v53  ;;  %1969 = vrot.lane.b32.xlu1 %v1961_v47, %s2714_s6 }
 0x28a   : > { %v1522_v31 = vpop.permute.xlu1 %1521 }
 0x28b   : > { %v1530_v21 = vsel %vm1529_vm6, %v1522_v31, %v3958_v36  ;;  %v1537_v9 = vadd.f32 %v1522_v31, %v1505_v56  ;;  %v1720_v52 = vpop.permute.xlu0 %1719 }
 0x28c   : > { %v1538_v63 = vadd.f32 %v1530_v21, %v1506_v13  ;;  %1973 = vrot.lane.b32.xlu1 %v1963_v37, %s2714_s6 }
 0x28e   : > { %v1526_v38 = vpop.permute.xlu1 %1525 }
 0x28f   : > { %v1531_v34 = vsel %vm1529_vm6, %v3958_v36, %v1526_v38  ;;  %v1532_v26 = vsel %vm1529_vm6, %v1526_v38, %v3968_v57  ;;  %v2025_v57 = vmul.f32 %v3790_v43, %v4361_v30  ;;  %v4084_v43 = vpop.permute.xlu0 %1747  ;;  %vm2009_vm6 = vcmask 72704  }
 0x290   : > { %v1539_v62 = vadd.f32 %v1531_v34, %v1507_v40  ;;  %v1540_v12 = vadd.f32 %v1532_v26, %v1508_v10  ;;  %2001 = vrot.lane.b32.xlu1 %v1993_v50, %s2715_s7 }
 0x292   : > { %v1554_v60 = vpop.permute.xlu1 %1553 }
 0x293   : > { %v1562_v54 = vsel %vm1561_vm7, %v1554_v60, %v3979_v19  ;;  %v1569_v49 = vadd.f32 %v1554_v60, %v1537_v9  ;;  %v4089_v30 = vpop.permute.xlu0 %1751 }
 0x294   : > { %v1570_v35 = vadd.f32 %v1562_v54, %v1538_v63  ;;  %2005 = vrot.lane.b32.xlu1 %v1995_v58, %s2715_s7 }
 0x296   : > { %v1558_v36 = vpop.permute.xlu1 %1557 }
 0x297   : > { %v1563_v15 = vsel %vm1561_vm7, %v3979_v19, %v1558_v36  ;;  %v1564_v8 = vsel %vm1561_vm7, %v1558_v36, %v3991_v20  ;;  %vm2068_vm7 = vcmask 490496  }
 0x298   : > { %v1571_v32 = vadd.f32 %v1563_v15, %v1539_v62  ;;  %v1572_v16 = vadd.f32 %v1564_v8, %v1540_v12  ;;  %2033 = vrot.lane.b32.xlu1 %v2025_v57, %s2716_s8 }
 0x29a   : > { %v1586_v5 = vpop.permute.xlu1 %1585 }
 0x29b   : > { %v1594_v11 = vsel %vm1593_vm8, %v1586_v5, %v4001_v39  ;;  %v1601_v29 = vadd.f32 %v1586_v5, %v1569_v49 }
 0x29c   : > { %v1602_v61 = vadd.f32 %v1594_v11, %v1570_v35  ;;  %2037 = vrot.lane.b32.xlu1 %v2027_v51, %s2716_s8 }
 0x29e   : > { %v1590_v19 = vpop.permute.xlu1 %1589 }
 0x29f   : > { %v1595_v20 = vsel %vm1593_vm8, %v4001_v39, %v1590_v19  ;;  %v1596_v17 = vsel %vm1593_vm8, %v1590_v19, %v4012_v6  ;;  %v4093_v39 = vpop.permute.xlu0 %1779 }
 0x2a0   : > { %v1603_v25 = vadd.f32 %v1595_v20, %v1571_v32  ;;  %v1604_v23 = vadd.f32 %v1596_v17, %v1572_v16 }
 0x2a2   : > { %v1618_v59 = vpop.permute.xlu1 %1617 }
 0x2a3   : > { %v1626_v18 = vsel %vm1625_vm9, %v1618_v59, %v4018_v24  ;;  %v1633_v7 = vadd.f32 %v1618_v59, %v1601_v29  ;;  %v4098_v47 = vpop.permute.xlu0 %1783 }
 0x2a4   : > { %v1634_v0 = vadd.f32 %v1626_v18, %v1602_v61 }
 0x2a6   : > { %v1622_v46 = vpop.permute.xlu1 %1621 }
 0x2a7   : > { %v1627_v3 = vsel %vm1625_vm9, %v4018_v24, %v1622_v46  ;;  %v1628_v55 = vsel %vm1625_vm9, %v1622_v46, %v4026_v45  ;;  %v4101_v31 = vpop.permute.xlu0 %1811 }
 0x2a8   : > { %v1635_v48 = vadd.f32 %v1627_v3, %v1603_v25  ;;  %v1636_v53 = vadd.f32 %v1628_v55, %v1604_v23 }
 0x2aa   : > { %v1650_v6 = vpop.permute.xlu1 %1649 }
 0x2ab   : > { %v1658_v44 = vsel %vm1657_vm10, %v1650_v6, %v4034_v22  ;;  %v1665_v27 = vadd.f32 %v1650_v6, %v1633_v7  ;;  %v4105_v50 = vpop.permute.xlu0 %1815 }
 0x2ac   : > { %v1666_v2 = vadd.f32 %v1658_v44, %v1634_v0 }
 0x2ae   : > { %v1654_v56 = vpop.permute.xlu1 %1653 }
 0x2af   : > { %v1659_v13 = vsel %vm1657_vm10, %v4034_v22, %v1654_v56  ;;  %v1660_v33 = vsel %vm1657_vm10, %v1654_v56, %v4044_v1  ;;  %v1844_v58 = vpop.permute.xlu0 %1843 }
 0x2b0   : > { %v1667_v24 = vadd.f32 %v1659_v13, %v1635_v48  ;;  %v1668_v14 = vadd.f32 %v1660_v33, %v1636_v53 }
 0x2b2   : > { %v1682_v45 = vpop.permute.xlu1 %1681 }
 0x2b3   : > { %v1690_v28 = vsel %vm1689_vm11, %v1682_v45, %v4051_v4  ;;  %v1697_v40 = vadd.f32 %v1682_v45, %v1665_v27  ;;  %v4110_v49 = vpop.permute.xlu0 %1847 }
 0x2b4   : > { %v1698_v10 = vadd.f32 %v1690_v28, %v1666_v2 }
 0x2b6   : > { %v1686_v37 = vpop.permute.xlu1 %1685 }
 0x2b7   : > { %v1691_v21 = vsel %vm1689_vm11, %v4051_v4, %v1686_v37  ;;  %v1692_v9 = vsel %vm1689_vm11, %v1686_v37, %v4061_v42  ;;  %v1876_v35 = vpop.permute.xlu0 %1875 }
 0x2b8   : > { %v1699_v22 = vadd.f32 %v1691_v21, %v1667_v24  ;;  %v1700_v63 = vadd.f32 %v1692_v9, %v1668_v14 }
 0x2ba   : > { %v1714_v1 = vpop.permute.xlu1 %1713 }
 0x2bb   : > { %v1729_v38 = vadd.f32 %v1714_v1, %v1697_v40  ;;  %v4112_v15 = vpop.permute.xlu0 %1879  ;;  %v1722_v23 = vsel %vm1721_vm12, %v1714_v1, %v4069_v41 }
 0x2bc   : > { %v1730_v7 = vadd.f32 %v1722_v23, %v1698_v10 }
 0x2be   : > { %v1718_v34 = vpop.permute.xlu1 %1717 }
 0x2bf   : > { %v1723_v26 = vsel %vm1721_vm12, %v4069_v41, %v1718_v34  ;;  %v1724_v62 = vsel %vm1721_vm12, %v1718_v34, %v1720_v52  ;;  %v4114_v32 = vpop.permute.xlu0 %1907 }
 0x2c0   : > { %v1731_v12 = vadd.f32 %v1723_v26, %v1699_v22  ;;  %v1732_v60 = vadd.f32 %v1724_v62, %v1700_v63 }
 0x2c2   : > { %v1746_v54 = vpop.permute.xlu1 %1745 }
 0x2c3   : > { %v4116_v51 = vpop.permute.xlu0 %1911  ;;  %v1754_v18 = vsel %vm1753_vm13, %v1746_v54, %v4084_v43  ;;  %v1761_v27 = vadd.f32 %v1746_v54, %v1729_v38 }
 0x2c4   : > { %v1762_v3 = vadd.f32 %v1754_v18, %v1730_v7 }
 0x2c6   : > { %v1750_v4 = vpop.permute.xlu1 %1749 }
 0x2c7   : > { %v4118_v11 = vpop.permute.xlu0 %1939  ;;  %v1755_v41 = vsel %vm1753_vm13, %v4084_v43, %v1750_v4  ;;  %v1756_v24 = vsel %vm1753_vm13, %v1750_v4, %v4089_v30 }
 0x2c8   : > { %v1763_v2 = vadd.f32 %v1755_v41, %v1731_v12  ;;  %v1764_v30 = vadd.f32 %v1756_v24, %v1732_v60 }
 0x2ca   : > { %v1778_v42 = vpop.permute.xlu1 %1777 }
 0x2cb   : > { %v4124_v19 = vpop.permute.xlu0 %1943  ;;  %v1786_v46 = vsel %vm1785_vm14, %v1778_v42, %v4093_v39  ;;  %v1793_v45 = vadd.f32 %v1778_v42, %v1761_v27 }
 0x2cc   : > { %v1794_v53 = vadd.f32 %v1786_v46, %v1762_v3 }
 0x2ce   : > { %v1782_v36 = vpop.permute.xlu1 %1781 }
 0x2cf   : > { %v4128_v17 = vpop.permute.xlu0 %1971  ;;  %v1787_v6 = vsel %vm1785_vm14, %v4093_v39, %v1782_v36  ;;  %v1788_v39 = vsel %vm1785_vm14, %v1782_v36, %v4098_v47 }
 0x2d0   : > { %v1795_v28 = vadd.f32 %v1787_v6, %v1763_v2  ;;  %v1796_v38 = vadd.f32 %v1788_v39, %v1764_v30 }
 0x2d2   : > { %v1810_v57 = vpop.permute.xlu1 %1809 }
 0x2d3   : > { %v4138_v0 = vpop.permute.xlu0 %1975  ;;  %v1818_v48 = vsel %vm1817_vm15, %v1810_v57, %v4101_v31  ;;  %v1825_v21 = vadd.f32 %v1810_v57, %v1793_v45 }
 0x2d4   : > { %v1826_v13 = vadd.f32 %v1818_v48, %v1794_v53 }
 0x2d6   : > { %v1814_v8 = vpop.permute.xlu1 %1813 }
 0x2d7   : > { %v2004_v56 = vpop.permute.xlu0 %2003  ;;  %v1819_v43 = vsel %vm1817_vm15, %v4101_v31, %v1814_v8  ;;  %v1820_v63 = vsel %vm1817_vm15, %v1814_v8, %v4105_v50 }
 0x2d8   : > { %v1827_v9 = vadd.f32 %v1819_v43, %v1795_v28  ;;  %v1828_v54 = vadd.f32 %v1820_v63, %v1796_v38 }
 0x2da   : > { %v1842_v16 = vpop.permute.xlu1 %1841 }
 0x2db   : > { %v1850_v44 = vsel %vm1849_vm1, %v1842_v16, %v1844_v58  ;;  %v2008_v34 = vpop.permute.xlu0 %2007  ;;  %v1857_v26 = vadd.f32 %v1842_v16, %v1825_v21  ;;  %v2052_v21 = vld [vmem:[#allocation3] sm:$0xff] }
 0x2dc   : > { %v1858_v40 = vadd.f32 %v1850_v44, %v1826_v13 }
 0x2de   : > { %v1846_v5 = vpop.permute.xlu1 %1845 }
 0x2df   : > { %v1851_v10 = vsel %vm1849_vm1, %v1844_v58, %v1846_v5  ;;  %v1852_v60 = vsel %vm1849_vm1, %v1846_v5, %v4110_v49  ;;  %v2036_v7 = vpop.permute.xlu0 %2035 }
 0x2e0   : > { %v1859_v62 = vadd.f32 %v1851_v10, %v1827_v9  ;;  %v2055_v10 = vld [vmem:[%s255_s10] sm:$0xff]  ;;  %v2053_v9 = vld [vmem:[#allocation3 + $0x8] sm:$0xff] }
 0x2e2   : > { %v1874_v52 = vpop.permute.xlu1 %1873 }
 0x2e3   : > { %v1882_v14 = vsel %vm1881_vm2, %v1874_v52, %v1876_v35  ;;  %v1889_v4 = vadd.f32 %v1874_v52, %v1857_v26 }
 0x2e4   : > { %v1890_v31 = vadd.f32 %v1882_v14, %v1858_v40 }
 0x2e6   : > { %v4120_v29 = vpop.permute.xlu1 %1877 }
 0x2e7   : > { %v1883_v1 = vsel %vm1881_vm2, %v1876_v35, %v4120_v29  ;;  %v1884_v57 = vsel %vm1881_vm2, %v4120_v29, %v4112_v15 }
 0x2e8   : > { %v1891_v42 = vadd.f32 %v1883_v1, %v1859_v62  ;;  %v2054_v1 = vld [vmem:[#allocation3 + $0x10] sm:$0xff] }
 0x2ea   : > { %v4122_v61 = vpop.permute.xlu1 %1905 }
 0x2eb   : > { %v1914_v37 = vsel %vm1913_vm3, %v4122_v61, %v4114_v32  ;;  %v1921_v16 = vadd.f32 %v4122_v61, %v1889_v4 }
 0x2ec   : > { %v1922_v12 = vadd.f32 %v1914_v37, %v1890_v31 }
 0x2ee   : > { %v4126_v20 = vpop.permute.xlu1 %1909 }
 0x2ef   : > { %v1915_v50 = vsel %vm1913_vm3, %v4114_v32, %v4126_v20  ;;  %v1860_v32 = vadd.f32 %v1852_v60, %v1828_v54  ;;  %v1916_v52 = vsel %vm1913_vm3, %v4126_v20, %v4116_v51 }
 0x2f0   : > { %v1923_v5 = vadd.f32 %v1915_v50, %v1891_v42 }
 0x2f1   : > { %v1892_v15 = vadd.f32 %v1884_v57, %v1860_v32 }
 0x2f2   : > { %v4130_v25 = vpop.permute.xlu1 %1937 }
 0x2f3   : > { %v1946_v47 = vsel %vm1945_vm4, %v4130_v25, %v4118_v11  ;;  %v1953_v29 = vadd.f32 %v4130_v25, %v1921_v16  ;;  %v1924_v53 = vadd.f32 %v1916_v52, %v1892_v15 }
 0x2f4   : > { %v1954_v35 = vadd.f32 %v1946_v47, %v1922_v12 }
 0x2f6   : > { %v4134_v59 = vpop.permute.xlu1 %1941 }
 0x2f7   : > { %v1947_v49 = vsel %vm1945_vm4, %v4118_v11, %v4134_v59  ;;  %v1948_v61 = vsel %vm1945_vm4, %v4134_v59, %v4124_v19 }
 0x2f8   : > { %v1955_v46 = vadd.f32 %v1947_v49, %v1923_v5  ;;  %v1956_v25 = vadd.f32 %v1948_v61, %v1924_v53 }
 0x2fa   : > { %v4142_v55 = vpop.permute.xlu1 %1969 }
 0x2fb   : > { %v1978_v58 = vsel %vm1977_vm5, %v4142_v55, %v4128_v17  ;;  %v1985_v51 = vadd.f32 %v4142_v55, %v1953_v29 }
 0x2fc   : > { %v1986_v23 = vadd.f32 %v1978_v58, %v1954_v35 }
 0x2fe   : > { %v1974_v33 = vpop.permute.xlu1 %1973 }
 0x2ff   : > { %v1979_v18 = vsel %vm1977_vm5, %v4128_v17, %v1974_v33  ;;  %v1980_v6 = vsel %vm1977_vm5, %v1974_v33, %v4138_v0 }
 0x300   : > { %v1987_v20 = vadd.f32 %v1979_v18, %v1955_v46  ;;  %v1988_v13 = vadd.f32 %v1980_v6, %v1956_v25 }
 0x302   : > { %v2002_v22 = vpop.permute.xlu1 %2001 }
 0x303   : > { %v2010_v8 = vsel %vm2009_vm6, %v2002_v22, %v2004_v56  ;;  %v2017_v44 = vadd.f32 %v2002_v22, %v1985_v51 }
 0x304   : > { %v2018_v11 = vadd.f32 %v2010_v8, %v1986_v23 }
 0x306   : > { %v2006_v36 = vpop.permute.xlu1 %2005 }
 0x307   : > { %v2011_v41 = vsel %vm2009_vm6, %v2004_v56, %v2006_v36  ;;  %v2012_v19 = vsel %vm2009_vm6, %v2006_v36, %v2008_v34  ;;  %v2040_v56 = vpop.permute.xlu0 %2039 }
 0x308   : > { %v2019_v27 = vadd.f32 %v2011_v41, %v1987_v20  ;;  %v2020_v14 = vadd.f32 %v2012_v19, %v1988_v13 }
 0x30a   : > { %v2034_v3 = vpop.permute.xlu1 %2033 }
 0x30b   : > { %v2041_v48 = vsel %vm274_vm0, %v2034_v3, %v2036_v7  ;;  %v2048_v24 = vadd.f32 %v2034_v3, %v2017_v44 }
 0x30c   : > { %v2049_v17 = vadd.f32 %v2041_v48, %v2018_v11 }
 0x30e   : > { %2062 = vrot.lane.b32.xlu1 %v2049_v17, %s2717_s9  ;;  %v2038_v2 = vpop.permute.xlu1 %2037 }
 0x30f   : > { %v2042_v59 = vsel %vm274_vm0, %v2036_v7, %v2038_v2  ;;  %v2043_v43 = vsel %vm274_vm0, %v2038_v2, %v2040_v56 }
 0x310   : > { %v2050_v55 = vadd.f32 %v2042_v59, %v2019_v27  ;;  %v2051_v0 = vadd.f32 %v2043_v43, %v2020_v14 }
 0x312   : > { %2060 = vrot.lane.b32.xlu1 %v2048_v24, %s2717_s9  ;;  %2064 = vrot.lane.b32.xlu0 %v2050_v55, %s2717_s9 }
 0x316   : > { %2066 = vrot.lane.b32.xlu0 %v2051_v0, %s2717_s9 }
 0x380   : > { %v2063_v33 = vpop.permute.xlu1 %2062 }
 0x384   : > { %v2061_v45 = vpop.permute.xlu1 %2060  ;;  %v2065_v28 = vpop.permute.xlu0 %2064 }
 0x385   : > { %v2069_v40 = vsel %vm2068_vm7, %v2061_v45, %v2063_v33  ;;  %v2070_v39 = vsel %vm2068_vm7, %v2063_v33, %v2065_v28 }
 0x386   : > { %2078 = vmatprep.subr.mxu0 %v2070_v39 }
 0x387   : > { %2079 = vmatpush1.msra.mxu0 %v2069_v40 }
 0x388   : > { %v2067_v37 = vpop.permute.xlu0 %2066  ;;  %2350 = vmatmul.mubr.msk.f32.vlgmr.msra.gmra.mrb[2].mxu0 %vm274_vm0, %v2055_v10 }
 0x389   : > { %v2071_v30 = vsel %vm2068_vm7, %v2065_v28, %v2067_v37 }
 0x38a   : > { %2365 = vmatpush3.msra.mxu1 %v2071_v30 }
 0x38b   : > { %2367 = vmatmul.mubr.msk.f32.vlgmr.msra.gmra.mrb[2].mxu1 %vm274_vm0, %v2055_v10 }
 0x45b   : > { %v2144_v31 = vpop.f32.mrb[2].mxu0  ;;  %2228 = sbr.rel (%p2352_p8) target bundleno = 1130 (0x46a), region = 44 }
 0x45c   : > { %v2219_v22 = vadd.f32 %v2144_v31, %v2052_v21  ;;  %v2146_v63 = vpop.f32.mrb[3].mxu0 }
 0x45d   : > { %v2220_v47 = vadd.f32 %v2146_v63, %v2053_v9 }
 0x45e   : > { %2222 = vst [vmem:[#allocation3] sm:$0xff] %v2219_v22  ;;  %v2215_v38 = vpop.f32.mrb[2].mxu1 }
 0x45f   : > { %2223 = vst [vmem:[#allocation3 + $0x8] sm:$0xff] %v2220_v47  ;;  %v2221_v34 = vadd.f32 %v2215_v38, %v2054_v1  ;;  %v2368_v26 = vpop.f32.mrb[3].mxu1 }
 0x461   : > { %2224 = vst [vmem:[#allocation3 + $0x10] sm:$0xff] %v2221_v34 }
 0x465   : > { %v2229_v62 = vld [vmem:[#allocation3] sm:$0xff] }
 0x466   : > { %v2230_v12 = vld [vmem:[#allocation3 + $0x8] sm:$0xff]  ;;  %2232 = vst [vmem:[%s2797_s13] sm:$0xff] %v2229_v62 }
 0x467   : > { %2233 = vst [vmem:[%s2797_s13 + $0x8] sm:$0xff] %v2230_v12 }
 0x468   : > { %v2231_v60 = vld [vmem:[#allocation3 + $0x10] sm:$0xff] }
 0x469   : > { %2234 = vst [vmem:[%s2797_s13 + $0x10] sm:$0xff] %v2231_v60 }
 0x46a PF: > { %s14_s19 = sadd.s32 1, %s2615_s19   ;;  %s4363_s15 = smov %s2607_s17 }
 0x46b   : > { %p11_p9 = scmp.ge.s32.totalorder %s14_s19, 6   ;;  %s4364_s16 = smov %s2611_s18 }
 0x46c   : > { %s4365_s17 = smov %s4368_s20  ;;  %s4366_s18 = smov %s4372_s21 }
 0x46d   :  { %13 = sbr.rel (!%p11_p9) target bundleno = 3 (0x3), region = 83 }

</bundles_post_ra>
